<compile_context>
chip_gen: v7x
topology: tpu7x:2x2x1
jax: 0.10.0
libtpu: 0.0.40
codegen_flags: <defaults>
</compile_context>

<pallas_src>
import functools

import jax
import jax.numpy as jnp
from jax.experimental import pallas as pl
from jax.experimental.pallas import tpu as pltpu


def _dis_kernel(x_ref, w1_ref, b1_ref, w2_ref, b2_ref, out_ref):
    # ---- Layer 1: (TB, X) @ (X, H) on the MXU, bf16 inputs / f32 accumulator.
    x = x_ref[...].astype(jnp.bfloat16)
    w1 = w1_ref[...].astype(jnp.bfloat16)
    h = jnp.dot(x, w1, preferred_element_type=jnp.float32)      # (TB, H) f32
    h = jnp.maximum(h + b1_ref[...], 0.0)                       # bias + ReLU (VPU, f32)

    # ---- Layer 2: output width 1 -> VPU multiply + lane reduce (keeps MXU idle-free,
    # avoids a 1-lane-wide matmul through the MRF).
    logits = jnp.sum(h * w2_ref[...], axis=-1, keepdims=True)   # (TB, 1) f32
    logits = logits + b2_ref[0, 0]                              # scalar bias from SMEM

    # ---- Sigmoid (EUP) + lane-dense store: batch lies on the lane axis.
    probs = jax.nn.sigmoid(logits)                              # (TB, 1)
    out_ref[...] = probs.reshape(1, -1).astype(out_ref.dtype)   # (1, TB)


@functools.partial(jax.jit, static_argnames=("block_b",))
def dis_forward(x, w1, b1, w2, b2, *, block_b=256):
    """Discriminator forward pass.

    x  : (B, X_dim)      float32
    w1 : (X_dim, H_dim)  float32   (pre-transposed: in_features x out_features)
    b1 : (H_dim,)        float32
    w2 : (H_dim, 1)      float32
    b2 : (1,)            float32
    returns (B, 1) float32 in (0, 1)
    """
    B, X_dim = x.shape
    H_dim = w1.shape[1]

    # Pad the batch up to a multiple of the tile size (lane-dense, MXU-friendly).
    B_pad = block_b * pl.cdiv(B, block_b)
    if B_pad != B:
        x = jnp.pad(x, ((0, B_pad - B), (0, 0)))
    n_tiles = B_pad // block_b

    b1_row = b1.reshape(1, H_dim)
    w2_row = w2.reshape(1, H_dim)
    b2_sc = b2.reshape(1, 1)

    cost = pl.CostEstimate(
        flops=2 * B_pad * X_dim * H_dim + 3 * B_pad * H_dim,
        transcendentals=B_pad,
        bytes_accessed=(B_pad * X_dim * 4 + X_dim * H_dim * 4
                        + 2 * H_dim * 4 + 4 + B_pad * 4),
    )

    out_row = pl.pallas_call(
        _dis_kernel,
        out_shape=jax.ShapeDtypeStruct((1, B_pad), jnp.float32),
        grid=(n_tiles,),
        in_specs=[
            # x: streamed per batch tile (auto double-buffered).
            pl.BlockSpec((block_b, X_dim), lambda i: (i, 0)),
            # weights / biases: constant index_map -> DMA'd once, VMEM-resident.
            pl.BlockSpec((X_dim, H_dim), lambda i: (0, 0)),
            pl.BlockSpec((1, H_dim), lambda i: (0, 0)),
            pl.BlockSpec((1, H_dim), lambda i: (0, 0)),
            # scalar output bias in SMEM.
            pl.BlockSpec(memory_space=pltpu.SMEM),
        ],
        # Lane-dense output: batch on the lane axis, one (1, TB) slab per grid step.
        out_specs=pl.BlockSpec((1, block_b), lambda i: (0, i)),
        compiler_params=pltpu.CompilerParams(
            dimension_semantics=("parallel",),
            vmem_limit_bytes=32 * 1024 * 1024,
        ),
        cost_estimate=cost,
    )(x, w1, b1_row, w2_row, b2_sc)

    # Back to the PyTorch (B, 1) layout outside the kernel.
    return out_row[0, :B].reshape(B, 1)


if __name__ == "__main__":
    # Small shapes consistent with Linear(X_dim, H_dim) -> ReLU -> Linear(H_dim, 1) -> Sigmoid.
    B, X_dim, H_dim = 8, 256, 128

    key = jax.random.PRNGKey(0)
    kx, kw1, kb1, kw2, kb2 = jax.random.split(key, 5)

    lim1 = 1.0 / jnp.sqrt(X_dim)
    lim2 = 1.0 / jnp.sqrt(H_dim)

    x = jax.random.normal(kx, (B, X_dim), dtype=jnp.float32)
    w1 = jax.random.uniform(kw1, (X_dim, H_dim), jnp.float32, -lim1, lim1)
    b1 = jax.random.uniform(kb1, (H_dim,), jnp.float32, -lim1, lim1)
    w2 = jax.random.uniform(kw2, (H_dim, 1), jnp.float32, -lim2, lim2)
    b2 = jax.random.uniform(kb2, (1,), jnp.float32, -lim2, lim2)

    out = jax.block_until_ready(dis_forward(x, w1, b1, w2, b2))

    # Pure-JAX f32 reference of the same forward pass.
    ref = jax.nn.sigmoid(jnp.maximum(x @ w1 + b1[None, :], 0.0) @ w2 + b2[None, :])
    assert out.shape == (B, 1)
    # bf16 MXU inputs (f32 accumulation) -> tolerance loosened vs the f32 reference.
    max_err = float(jnp.max(jnp.abs(out - ref)))
    assert jnp.allclose(out, ref, atol=5e-3, rtol=5e-3), f"max abs err = {max_err}"

    print("KERNEL_OK")
</pallas_src>

<mosaic_0001>
module attributes {stable_mosaic.version = 11 : i64} {
  func.func @_dis_kernel(%arg0: i32, %arg1: memref<256x256xf32, #tpu.memory_space<vmem>>, %arg2: memref<256x128xf32, #tpu.memory_space<vmem>>, %arg3: memref<1x128xf32, #tpu.memory_space<vmem>>, %arg4: memref<1x128xf32, #tpu.memory_space<vmem>>, %arg5: memref<1x1xf32, #tpu.memory_space<smem>>, %arg6: memref<1x256xf32, #tpu.memory_space<vmem>>) attributes {dimension_semantics = [#tpu.dimension_semantics<parallel>], iteration_bounds = array<i64: 1>, scalar_prefetch = 0 : i64, scratch_operands = 0 : i64, tpu.core_type = #tpu.core_type<tc>, window_params = [{transform_indices = @transform_0, window_bounds = array<i64: 256, 256>}, {pipeline_mode = #tpu.pipeline_mode<synchronous>, transform_indices = @transform_1, window_bounds = array<i64: 256, 128>}, {pipeline_mode = #tpu.pipeline_mode<synchronous>, transform_indices = @transform_2, window_bounds = array<i64: 1, 128>}, {pipeline_mode = #tpu.pipeline_mode<synchronous>, transform_indices = @transform_3, window_bounds = array<i64: 1, 128>}, {transform_indices = @transform_4, window_bounds = array<i64: 1, 1>}, {transform_indices = @transform_5, window_bounds = array<i64: 1, 256>}]} {
    %c0 = arith.constant 0 : index
    %c0_0 = arith.constant 0 : index
    %0 = vector.load %arg1[%c0, %c0_0] : memref<256x256xf32, #tpu.memory_space<vmem>>, vector<256x256xf32>
    %1 = arith.truncf %0 : vector<256x256xf32> to vector<256x256xbf16>
    %c0_1 = arith.constant 0 : index
    %c0_2 = arith.constant 0 : index
    %2 = vector.load %arg2[%c0_1, %c0_2] : memref<256x128xf32, #tpu.memory_space<vmem>>, vector<256x128xf32>
    %3 = arith.truncf %2 : vector<256x128xf32> to vector<256x128xbf16>
    %cst = arith.constant dense<0.000000e+00> : vector<256x128xf32>
    %4 = tpu.matmul %1, %3, %cst {dimension_numbers = #tpu.dot_dimension_numbers<[1], [0], [0], [1], [0, 0, 1, 1], [], []>} : vector<256x256xbf16>, vector<256x128xbf16>, vector<256x128xf32> -> vector<256x128xf32>
    %c0_3 = arith.constant 0 : index
    %c0_4 = arith.constant 0 : index
    %5 = vector.load %arg3[%c0_3, %c0_4] : memref<1x128xf32, #tpu.memory_space<vmem>>, vector<1x128xf32>
    %6 = vector.broadcast %5 : vector<1x128xf32> to vector<256x128xf32>
    %7 = arith.addf %4, %6 : vector<256x128xf32>
    %cst_5 = arith.constant 0.000000e+00 : f32
    %8 = vector.broadcast %cst_5 : f32 to vector<256x128xf32>
    %9 = arith.maximumf %7, %8 : vector<256x128xf32>
    %c0_6 = arith.constant 0 : index
    %c0_7 = arith.constant 0 : index
    %10 = vector.load %arg4[%c0_6, %c0_7] : memref<1x128xf32, #tpu.memory_space<vmem>>, vector<1x128xf32>
    %11 = vector.broadcast %10 : vector<1x128xf32> to vector<256x128xf32>
    %12 = arith.mulf %9, %11 : vector<256x128xf32>
    %cst_8 = arith.constant dense<0.000000e+00> : vector<256xf32>
    %13 = vector.multi_reduction <add>, %12, %cst_8 [1] : vector<256x128xf32> to vector<256xf32>
    %14 = vector.shape_cast %13 : vector<256xf32> to vector<256x1xf32>
    %c0_9 = arith.constant 0 : index
    %c0_10 = arith.constant 0 : index
    %15 = memref.load %arg5[%c0_9, %c0_10] : memref<1x1xf32, #tpu.memory_space<smem>>
    %16 = vector.broadcast %15 : f32 to vector<256x1xf32>
    %17 = arith.addf %14, %16 : vector<256x1xf32>
    %18 = arith.negf %17 : vector<256x1xf32>
    %19 = math.exp %18 : vector<256x1xf32>
    %cst_11 = arith.constant 1.000000e+00 : f32
    %20 = vector.broadcast %cst_11 : f32 to vector<256x1xf32>
    %21 = arith.addf %20, %19 : vector<256x1xf32>
    %22 = arith.divf %20, %21 : vector<256x1xf32>
    %23 = vector.shape_cast %22 : vector<256x1xf32> to vector<1x256xf32>
    %c0_12 = arith.constant 0 : index
    %c0_13 = arith.constant 0 : index
    %24 = vector.load %arg6[%c0_12, %c0_13] : memref<1x256xf32, #tpu.memory_space<vmem>>, vector<1x256xf32>
    tpu.vector_store %arg6[%c0_12, %c0_13], %23 {strides = array<i32>} : memref<1x256xf32, #tpu.memory_space<vmem>>, vector<1x256xf32>,
    return
  }
  func.func @transform_0(%arg0: i32) -> (i32, i32) {
    %c0_i32 = arith.constant 0 : i32
    %c0_i32_0 = arith.constant 0 : i32
    return %arg0, %c0_i32 : i32, i32
  }
  func.func @transform_1(%arg0: i32) -> (i32, i32) {
    %c0_i32 = arith.constant 0 : i32
    %c0_i32_0 = arith.constant 0 : i32
    %c0_i32_1 = arith.constant 0 : i32
    return %c0_i32, %c0_i32_0 : i32, i32
  }
  func.func @transform_2(%arg0: i32) -> (i32, i32) {
    %c0_i32 = arith.constant 0 : i32
    %c0_i32_0 = arith.constant 0 : i32
    %c0_i32_1 = arith.constant 0 : i32
    return %c0_i32, %c0_i32_0 : i32, i32
  }
  func.func @transform_3(%arg0: i32) -> (i32, i32) {
    %c0_i32 = arith.constant 0 : i32
    %c0_i32_0 = arith.constant 0 : i32
    %c0_i32_1 = arith.constant 0 : i32
    return %c0_i32, %c0_i32_0 : i32, i32
  }
  func.func @transform_4(%arg0: i32) -> (i32, i32) {
    %c0_i32 = arith.constant 0 : i32
    %c0_i32_0 = arith.constant 0 : i32
    %c0_i32_1 = arith.constant 0 : i32
    return %c0_i32, %c0_i32_0 : i32, i32
  }
  func.func @transform_5(%arg0: i32) -> (i32, i32) {
    %c0_i32 = arith.constant 0 : i32
    %c0_i32_0 = arith.constant 0 : i32
    return %c0_i32, %arg0 : i32, i32
  }
}

</mosaic_0001>

<bundles_post_ra>
// kernel: dis_forward.1
= control target key start
LH: loop header
LB: loop body
LE: loop exit
PB: predicated region body
PF: predicated region fallthrough
CT: control target
= control target key end

     0   :  { %vm3426_vm0 = vcmask 130112   ;;  %vm3433_vm1 = vcmask 195712   ;;  %vm3440_vm2 = vcmask 261312   ;;  %vm3447_vm3 = vcmask 326912   ;;  %s5262_s1 = inlined_call_operand.vmem [shape: f32[256,128], index: 1, kind: input, shape index: {}]   ;;  %s5263_s0 = inlined_call_operand.vmem [shape: f32[256,256], index: 0, kind: input, shape index: {}]   ;;  %s5264_s2 = inlined_call_operand.vmem [shape: f32[1,128], index: 2, kind: input, shape index: {}]   ;;  %s5265_s3 = inlined_call_operand.vmem [shape: f32[1,128], index: 3, kind: input, shape index: {}]   ;;  %s5266_s4 = inlined_call_operand.<no memory space> [shape: f32[1,1], index: 4, kind: input, shape index: {}]   ;;  %s5267_s5 = inlined_call_operand.vmem [shape: f32[1,256], index: 5, kind: output, shape index: {}]  }
   0x1   :  { %v134_v0 = vld [vmem:[%s5262_s1 + $0x80] sm:$0xff]  ;;  %v135_v1 = vld [vmem:[%s5262_s1 + $0x88] sm:$0xff]  ;;  %v136_v5 = vld [vmem:[%s5262_s1 + $0x90] sm:$0xff]  ;;  %vm3454_vm4 = vcmask 392512   ;;  %vm3461_vm5 = vcmask 458112   ;;  %vm3468_vm6 = vcmask 523712  }
   0x2   :  { %v118_v2 = vld [vmem:[%s5262_s1] sm:$0xff]  ;;  %v158_v3 = vpack.c.bf16 %v135_v1, %v134_v0  ;;  %v119_v4 = vld [vmem:[%s5262_s1 + $0x8] sm:$0xff]  ;;  %v137_v6 = vld [vmem:[%s5262_s1 + $0x98] sm:$0xff]  ;;  %vm3475_vm7 = vcmask 589312   ;;  %vm3482_vm8 = vcmask 654912   ;;  %vm3489_vm9 = vcmask 720512  }
   0x3   :  { %v150_v7 = vpack.c.bf16 %v119_v4, %v118_v2  ;;  %v159_v8 = vpack.c.bf16 %v137_v6, %v136_v5  ;;  %v120_v9 = vld [vmem:[%s5262_s1 + $0x10] sm:$0xff]  ;;  %v121_v10 = vld [vmem:[%s5262_s1 + $0x18] sm:$0xff]  ;;  %v138_v11 = vld [vmem:[%s5262_s1 + $0xa0] sm:$0xff]  ;;  %vm3496_vm10 = vcmask 786112   ;;  %vm3503_vm11 = vcmask 851712  }
   0x4   :  { %3664 = vmatprep.subr.bf16.mxu0 %v158_v3  ;;  %3776 = vmatprep.subr.bf16.mxu1 %v158_v3  ;;  %v139_v12 = vld [vmem:[%s5262_s1 + $0xa8] sm:$0xff]  ;;  %v151_v13 = vpack.c.bf16 %v121_v10, %v120_v9  ;;  %v122_v15 = vld [vmem:[%s5262_s1 + $0x20] sm:$0xff]  ;;  %v140_v17 = vld [vmem:[%s5262_s1 + $0xb0] sm:$0xff]  ;;  %vm3510_vm12 = vcmask 917312   ;;  %vm3517_vm13 = vcmask 982912   ;;  %vm3524_vm14 = vcmask 1048512  }
   0x5   :  { %3665 = vmatpush3.bf16.msra.mxu0 %v150_v7  ;;  %3784 = vmatpush3.bf16.msra.mxu1 %v150_v7  ;;  %v160_v14 = vpack.c.bf16 %v139_v12, %v138_v11  ;;  %v123_v16 = vld [vmem:[%s5262_s1 + $0x28] sm:$0xff]  ;;  %v141_v18 = vld [vmem:[%s5262_s1 + $0xb8] sm:$0xff]  ;;  %v124_v21 = vld [vmem:[%s5262_s1 + $0x30] sm:$0xff] }
   0x6   :  { %3666 = vmatprep.subr.bf16.mxu0 %v159_v8  ;;  %3777 = vmatprep.subr.bf16.mxu1 %v159_v8  ;;  %v152_v19 = vpack.c.bf16 %v123_v16, %v122_v15  ;;  %v161_v20 = vpack.c.bf16 %v141_v18, %v140_v17  ;;  %v125_v22 = vld [vmem:[%s5262_s1 + $0x38] sm:$0xff]  ;;  %v142_v23 = vld [vmem:[%s5262_s1 + $0xc0] sm:$0xff]  ;;  %v143_v24 = vld [vmem:[%s5262_s1 + $0xc8] sm:$0xff] }
   0x7   :  { %v23_v25 = vld [vmem:[%s5263_s0 + $0x8] sm:$0xff]  ;;  %v25_v26 = vld [vmem:[%s5263_s0 + $0x18] sm:$0xff]  ;;  %v153_v29 = vpack.c.bf16 %v125_v22, %v124_v21  ;;  %v162_v32 = vpack.c.bf16 %v143_v24, %v142_v23  ;;  %v126_v33 = vld [vmem:[%s5262_s1 + $0x40] sm:$0xff] }
   0x8   :  { %v55_v27 = vld [vmem:[%s5263_s0 + $0x108] sm:$0xff]  ;;  %v57_v28 = vld [vmem:[%s5263_s0 + $0x118] sm:$0xff]  ;;  %v87_v30 = vpack.c.bf16 %v25_v26, %v23_v25  ;;  %v144_v35 = vld [vmem:[%s5262_s1 + $0xd0] sm:$0xff] }
   0x9   :  { %3667 = vmatpush3.bf16.msra.mxu0 %v151_v13  ;;  %3785 = vmatpush3.bf16.msra.mxu1 %v151_v13  ;;  %v103_v31 = vpack.c.bf16 %v57_v28, %v55_v27  ;;  %v127_v34 = vld [vmem:[%s5262_s1 + $0x48] sm:$0xff]  ;;  %v145_v36 = vld [vmem:[%s5262_s1 + $0xd8] sm:$0xff]  ;;  %v128_v39 = vld [vmem:[%s5262_s1 + $0x50] sm:$0xff] }
   0xa   :  { %3668 = vmatprep.subr.bf16.mxu0 %v160_v14  ;;  %3778 = vmatprep.subr.bf16.mxu1 %v160_v14  ;;  %v154_v37 = vpack.c.bf16 %v127_v34, %v126_v33  ;;  %v163_v38 = vpack.c.bf16 %v145_v36, %v144_v35  ;;  %v129_v40 = vld [vmem:[%s5262_s1 + $0x58] sm:$0xff]  ;;  %v146_v41 = vld [vmem:[%s5262_s1 + $0xe0] sm:$0xff]  ;;  %v147_v42 = vld [vmem:[%s5262_s1 + $0xe8] sm:$0xff] }
   0xb   :  { %205 = vmatprep.mubr.bf16.mxu0 %v87_v30  ;;  %269 = vmatprep.mubr.bf16.mxu1 %v103_v31  ;;  %v155_v43 = vpack.c.bf16 %v129_v40, %v128_v39  ;;  %v164_v44 = vpack.c.bf16 %v147_v42, %v146_v41  ;;  %v130_v45 = vld [vmem:[%s5262_s1 + $0x60] sm:$0xff]  ;;  %v131_v46 = vld [vmem:[%s5262_s1 + $0x68] sm:$0xff]  ;;  %v148_v47 = vld [vmem:[%s5262_s1 + $0xf0] sm:$0xff] }
   0xc   :  { %v149_v48 = vld [vmem:[%s5262_s1 + $0xf8] sm:$0xff]  ;;  %v156_v49 = vpack.c.bf16 %v131_v46, %v130_v45  ;;  %v132_v51 = vld [vmem:[%s5262_s1 + $0x70] sm:$0xff]  ;;  %v22_v53 = vld [vmem:[%s5263_s0] sm:$0xff] }
   0xd   :  { %3669 = vmatpush3.bf16.msra.mxu0 %v152_v19  ;;  %3786 = vmatpush3.bf16.msra.mxu1 %v152_v19  ;;  %v165_v50 = vpack.c.bf16 %v149_v48, %v148_v47  ;;  %v133_v52 = vld [vmem:[%s5262_s1 + $0x78] sm:$0xff]  ;;  %v24_v54 = vld [vmem:[%s5263_s0 + $0x10] sm:$0xff]  ;;  %v54_v56 = vld [vmem:[%s5263_s0 + $0x100] sm:$0xff] }
   0xe   :  { %3670 = vmatprep.subr.bf16.mxu0 %v161_v20  ;;  %3779 = vmatprep.subr.bf16.mxu1 %v161_v20  ;;  %v157_v55 = vpack.c.bf16 %v133_v52, %v132_v51  ;;  %v56_v57 = vld [vmem:[%s5263_s0 + $0x110] sm:$0xff]  ;;  %v27_v58 = vld [vmem:[%s5263_s0 + $0x28] sm:$0xff]  ;;  %v29_v59 = vld [vmem:[%s5263_s0 + $0x38] sm:$0xff]  ;;  %v86_v62 = vpack.c.bf16 %v24_v54, %v22_v53 }
   0xf   :  { %v59_v60 = vld [vmem:[%s5263_s0 + $0x128] sm:$0xff]  ;;  %v61_v61 = vld [vmem:[%s5263_s0 + $0x138] sm:$0xff]  ;;  %v102_v63 = vpack.c.bf16 %v56_v57, %v54_v56  ;;  %v89_v0 = vpack.c.bf16 %v29_v59, %v27_v58  ;;  %v26_v2 = vld [vmem:[%s5263_s0 + $0x20] sm:$0xff] }
  0x10   :  { %v105_v1 = vpack.c.bf16 %v61_v61, %v59_v60  ;;  %v28_v3 = vld [vmem:[%s5263_s0 + $0x30] sm:$0xff]  ;;  %v58_v4 = vld [vmem:[%s5263_s0 + $0x120] sm:$0xff]  ;;  %v31_v6 = vld [vmem:[%s5263_s0 + $0x48] sm:$0xff] }
  0x11   :  { %3671 = vmatpush3.bf16.msra.mxu0 %v153_v29  ;;  %3787 = vmatpush3.bf16.msra.mxu1 %v153_v29  ;;  %v60_v5 = vld [vmem:[%s5263_s0 + $0x130] sm:$0xff]  ;;  %v33_v7 = vld [vmem:[%s5263_s0 + $0x58] sm:$0xff]  ;;  %v63_v8 = vld [vmem:[%s5263_s0 + $0x148] sm:$0xff]  ;;  %v88_v10 = vpack.c.bf16 %v28_v3, %v26_v2 }
  0x12   :  { %3672 = vmatprep.subr.bf16.mxu0 %v162_v32  ;;  %3780 = vmatprep.subr.bf16.mxu1 %v162_v32  ;;  %v65_v9 = vld [vmem:[%s5263_s0 + $0x158] sm:$0xff]  ;;  %v104_v11 = vpack.c.bf16 %v60_v5, %v58_v4  ;;  %v91_v12 = vpack.c.bf16 %v33_v7, %v31_v6  ;;  %v30_v14 = vld [vmem:[%s5263_s0 + $0x40] sm:$0xff]  ;;  %v32_v15 = vld [vmem:[%s5263_s0 + $0x50] sm:$0xff] }
  0x13   :  { %v107_v13 = vpack.c.bf16 %v65_v9, %v63_v8  ;;  %v62_v16 = vld [vmem:[%s5263_s0 + $0x140] sm:$0xff]  ;;  %v64_v17 = vld [vmem:[%s5263_s0 + $0x150] sm:$0xff]  ;;  %v35_v18 = vld [vmem:[%s5263_s0 + $0x68] sm:$0xff]  ;;  %v90_v22 = vpack.c.bf16 %v32_v15, %v30_v14 }
  0x14   :  { %v37_v19 = vld [vmem:[%s5263_s0 + $0x78] sm:$0xff]  ;;  %v67_v20 = vld [vmem:[%s5263_s0 + $0x168] sm:$0xff]  ;;  %v106_v23 = vpack.c.bf16 %v64_v17, %v62_v16  ;;  %v34_v26 = vld [vmem:[%s5263_s0 + $0x60] sm:$0xff] }
  0x15   :  { %3673 = vmatpush3.bf16.msra.mxu0 %v154_v37  ;;  %3788 = vmatpush3.bf16.msra.mxu1 %v154_v37  ;;  %v69_v21 = vld [vmem:[%s5263_s0 + $0x178] sm:$0xff]  ;;  %v93_v24 = vpack.c.bf16 %v37_v19, %v35_v18  ;;  %v36_v27 = vld [vmem:[%s5263_s0 + $0x70] sm:$0xff]  ;;  %v66_v28 = vld [vmem:[%s5263_s0 + $0x160] sm:$0xff] }
  0x16   :  { %3674 = vmatprep.subr.bf16.mxu0 %v163_v38  ;;  %3781 = vmatprep.subr.bf16.mxu1 %v163_v38  ;;  %v109_v25 = vpack.c.bf16 %v69_v21, %v67_v20  ;;  %v68_v29 = vld [vmem:[%s5263_s0 + $0x170] sm:$0xff]  ;;  %v39_v30 = vld [vmem:[%s5263_s0 + $0x88] sm:$0xff]  ;;  %v41_v31 = vld [vmem:[%s5263_s0 + $0x98] sm:$0xff]  ;;  %v92_v34 = vpack.c.bf16 %v36_v27, %v34_v26 }
  0x17   :  { %v71_v32 = vld [vmem:[%s5263_s0 + $0x188] sm:$0xff]  ;;  %v73_v33 = vld [vmem:[%s5263_s0 + $0x198] sm:$0xff]  ;;  %v108_v35 = vpack.c.bf16 %v68_v29, %v66_v28  ;;  %v95_v36 = vpack.c.bf16 %v41_v31, %v39_v30  ;;  %v38_v38 = vld [vmem:[%s5263_s0 + $0x80] sm:$0xff] }
  0x18   :  { %v111_v37 = vpack.c.bf16 %v73_v33, %v71_v32  ;;  %v40_v39 = vld [vmem:[%s5263_s0 + $0x90] sm:$0xff]  ;;  %v70_v40 = vld [vmem:[%s5263_s0 + $0x180] sm:$0xff]  ;;  %v75_v42 = vld [vmem:[%s5263_s0 + $0x1a8] sm:$0xff] }
  0x19   :  { %3675 = vmatpush3.bf16.msra.mxu0 %v155_v43  ;;  %3789 = vmatpush3.bf16.msra.mxu1 %v155_v43  ;;  %v72_v41 = vld [vmem:[%s5263_s0 + $0x190] sm:$0xff]  ;;  %v77_v43 = vld [vmem:[%s5263_s0 + $0x1b8] sm:$0xff]  ;;  %v94_v46 = vpack.c.bf16 %v40_v39, %v38_v38  ;;  %v42_v52 = vld [vmem:[%s5263_s0 + $0xa0] sm:$0xff] }
  0x1a   :  { %3676 = vmatprep.subr.bf16.mxu0 %v164_v44  ;;  %3782 = vmatprep.subr.bf16.mxu1 %v164_v44  ;;  %v43_v44 = vld [vmem:[%s5263_s0 + $0xa8] sm:$0xff]  ;;  %v45_v45 = vld [vmem:[%s5263_s0 + $0xb8] sm:$0xff]  ;;  %v110_v47 = vpack.c.bf16 %v72_v41, %v70_v40  ;;  %v113_v48 = vpack.c.bf16 %v77_v43, %v75_v42  ;;  %v76_v51 = vld [vmem:[%s5263_s0 + $0x1b0] sm:$0xff] }
  0x1b   :  { %v44_v53 = vld [vmem:[%s5263_s0 + $0xb0] sm:$0xff]  ;;  %v79_v54 = vld [vmem:[%s5263_s0 + $0x1c8] sm:$0xff]  ;;  %v49_v57 = vld [vmem:[%s5263_s0 + $0xd8] sm:$0xff] }
  0x1c   :  { %v47_v56 = vld [vmem:[%s5263_s0 + $0xc8] sm:$0xff]  ;;  %v96_v59 = vpack.c.bf16 %v44_v53, %v42_v52  ;;  %v85_v3 = vld [vmem:[%s5263_s0 + $0x1f8] sm:$0xff]  ;;  %v4247_v20 = vld [vmem:[%s5264_s2] ss:$0 sm:$0xff] }
  0x1d   :  { %3677 = vmatpush3.bf16.msra.mxu0 %v156_v49  ;;  %3790 = vmatpush3.bf16.msra.mxu1 %v156_v49  ;;  %v97_v49 = vpack.c.bf16 %v45_v45, %v43_v44  ;;  %v99_v61 = vpack.c.bf16 %v49_v57, %v47_v56  ;;  %v83_v2 = vld [vmem:[%s5263_s0 + $0x1e8] sm:$0xff]  ;;  %v53_v5 = vld [vmem:[%s5263_s0 + $0xf8] sm:$0xff]  ;;  %v4254_v31 = vld [vmem:[%s5265_s3] ss:$0 sm:$0xff] }
  0x1e   :  { %3678 = vmatprep.subr.bf16.mxu0 %v165_v50  ;;  %3783 = vmatprep.subr.bf16.mxu1 %v165_v50  ;;  %v74_v50 = vld [vmem:[%s5263_s0 + $0x1a0] sm:$0xff]  ;;  %v51_v4 = vld [vmem:[%s5263_s0 + $0xe8] sm:$0xff]  ;;  %v117_v8 = vpack.c.bf16 %v85_v3, %v83_v2 }
  0x1f   :  { %v112_v58 = vpack.c.bf16 %v76_v51, %v74_v50  ;;  %v101_v9 = vpack.c.bf16 %v53_v5, %v51_v4 }
  0x21   :  { %3679 = vmatpush3.bf16.msra.mxu0 %v157_v55  ;;  %3791 = vmatpush3.bf16.msra.mxu1 %v157_v55  ;;  %v81_v55 = vld [vmem:[%s5263_s0 + $0x1d8] sm:$0xff] }
  0x22   :  { %v115_v60 = vpack.c.bf16 %v81_v55, %v79_v54 }
  0x24   :  { %206 = vmatmul.mubr.bf16.vlgmr.msra.gmra.mrb[0].mxu0 %v86_v62  ;;  %270 = vmatmul.mubr.bf16.vlgmr.msra.gmra.mrb[0].mxu1 %v102_v63  ;;  %v78_v62 = vld [vmem:[%s5263_s0 + $0x1c0] sm:$0xff]  ;;  %v80_v63 = vld [vmem:[%s5263_s0 + $0x1d0] sm:$0xff] }
  0x25   :  { %213 = vmatprep.mubr.bf16.mxu0 %v89_v0  ;;  %277 = vmatprep.mubr.bf16.mxu1 %v105_v1  ;;  %v46_v0 = vld [vmem:[%s5263_s0 + $0xc0] sm:$0xff]  ;;  %v48_v1 = vld [vmem:[%s5263_s0 + $0xd0] sm:$0xff]  ;;  %v114_v6 = vpack.c.bf16 %v80_v63, %v78_v62 }
  0x26   :  { %v98_v7 = vpack.c.bf16 %v48_v1, %v46_v0 }
  0x2c   :  { %214 = vmatmul.mubr.bf16.gmra.mrb[4].mxu0 %v88_v10  ;;  %278 = vmatmul.mubr.bf16.gmra.mrb[4].mxu1 %v104_v11  ;;  %v82_v10 = vld [vmem:[%s5263_s0 + $0x1e0] sm:$0xff]  ;;  %v84_v11 = vld [vmem:[%s5263_s0 + $0x1f0] sm:$0xff] }
  0x2d   :  { %221 = vmatprep.mubr.bf16.mxu0 %v91_v12  ;;  %285 = vmatprep.mubr.bf16.mxu1 %v107_v13  ;;  %v50_v12 = vld [vmem:[%s5263_s0 + $0xe0] sm:$0xff]  ;;  %v52_v13 = vld [vmem:[%s5263_s0 + $0xf0] sm:$0xff]  ;;  %v116_v14 = vpack.c.bf16 %v84_v11, %v82_v10 }
  0x2e   :  { %v100_v15 = vpack.c.bf16 %v52_v13, %v50_v12 }
  0x34   :  { %222 = vmatmul.mubr.bf16.gmra.mrb[8].mxu0 %v90_v22  ;;  %286 = vmatmul.mubr.bf16.gmra.mrb[8].mxu1 %v106_v23 }
  0x35   :  { %229 = vmatprep.mubr.bf16.mxu0 %v93_v24  ;;  %293 = vmatprep.mubr.bf16.mxu1 %v109_v25 }
  0x3c   :  { %230 = vmatmul.mubr.bf16.gmra.mrb[12].mxu0 %v92_v34  ;;  %294 = vmatmul.mubr.bf16.gmra.mrb[12].mxu1 %v108_v35 }
  0x3d   :  { %237 = vmatprep.mubr.bf16.mxu0 %v95_v36  ;;  %301 = vmatprep.mubr.bf16.mxu1 %v111_v37 }
  0x44   :  { %238 = vmatmul.mubr.bf16.gmra.mrb[16].mxu0 %v94_v46  ;;  %302 = vmatmul.mubr.bf16.gmra.mrb[16].mxu1 %v110_v47 }
  0x45   :  { %309 = vmatprep.mubr.bf16.mxu1 %v113_v48  ;;  %245 = vmatprep.mubr.bf16.mxu0 %v97_v49 }
  0x4c   :  { %310 = vmatmul.mubr.bf16.gmra.mrb[20].mxu1 %v112_v58  ;;  %246 = vmatmul.mubr.bf16.gmra.mrb[20].mxu0 %v96_v59 }
  0x4d   :  { %317 = vmatprep.mubr.bf16.mxu1 %v115_v60  ;;  %253 = vmatprep.mubr.bf16.mxu0 %v99_v61 }
  0x54   :  { %318 = vmatmul.mubr.bf16.gmra.mrb[24].mxu1 %v114_v6  ;;  %254 = vmatmul.mubr.bf16.gmra.mrb[24].mxu0 %v98_v7 }
  0x55   :  { %325 = vmatprep.mubr.bf16.mxu1 %v117_v8  ;;  %261 = vmatprep.mubr.bf16.mxu0 %v101_v9 }
  0x5c   :  { %326 = vmatmul.mubr.bf16.gmra.mrb[28].mxu1 %v116_v14  ;;  %262 = vmatmul.mubr.bf16.gmra.mrb[28].mxu0 %v100_v15 }
  0xf7   :  { %v3680_v16 = vpop.f32.mrb[0].mxu0  ;;  %v3728_v17 = vpop.f32.mrb[0].mxu1 }
  0xf8   :  { %v3681_v18 = vpop.f32.mrb[1].mxu0  ;;  %v3729_v19 = vpop.f32.mrb[1].mxu1 }
  0xf9   :  { %v3682_v21 = vadd.f32 %v3681_v18, %v3680_v16  ;;  %v3730_v22 = vadd.f32 %v3729_v19, %v3728_v17  ;;  %v3683_v23 = vpop.f32.mrb[2].mxu0  ;;  %v3731_v24 = vpop.f32.mrb[2].mxu1 }
  0xfa   :  { %v3684_v25 = vpop.f32.mrb[3].mxu0  ;;  %v3732_v26 = vpop.f32.mrb[3].mxu1 }
  0xfb   :  { %v3685_v27 = vadd.f32 %v3684_v25, %v3683_v23  ;;  %v3733_v28 = vadd.f32 %v3732_v26, %v3731_v24  ;;  %v272_v29 = vadd.f32 %v3730_v22, %v4247_v20  ;;  %v208_v30 = vadd.f32 %v3682_v21, %v4247_v20 }
  0xfd   :  { %v211_v32 = vadd.f32 %v3685_v27, %v4247_v20  ;;  %v350_v33 = vmax.f32 %v272_v29, 0.0  ;;  %v334_v34 = vmax.f32 %v208_v30, 0.0  ;;  %v275_v35 = vadd.f32 %v3733_v28, %v4247_v20 }
  0xff   :  { %v335_v36 = vmax.f32 %v211_v32, 0.0  ;;  %v3686_v37 = vpop.f32.mrb[4].mxu0  ;;  %v3734_v38 = vpop.f32.mrb[4].mxu1  ;;  %v389_v39 = vmul.f32 %v4254_v31, %v350_v33  ;;  %v373_v40 = vmul.f32 %v4254_v31, %v334_v34  ;;  %v351_v47 = vmax.f32 %v275_v35, 0.0 }
 0x100   :  { %v3687_v41 = vpop.f32.mrb[5].mxu0  ;;  %v3735_v42 = vpop.f32.mrb[5].mxu1 }
 0x101   :  { %v3688_v43 = vadd.f32 %v3687_v41, %v3686_v37  ;;  %v3736_v44 = vadd.f32 %v3735_v42, %v3734_v38  ;;  %437 = vadd.xlane.f32.xlu1 %v389_v39  ;;  %v3689_v45 = vpop.f32.mrb[6].mxu0  ;;  %405 = vadd.xlane.f32.xlu0 %v373_v40  ;;  %v3737_v46 = vpop.f32.mrb[6].mxu1  ;;  %v374_v50 = vmul.f32 %v4254_v31, %v335_v36 }
 0x102   :  { %v3690_v48 = vpop.f32.mrb[7].mxu0  ;;  %v3738_v49 = vpop.f32.mrb[7].mxu1  ;;  %v390_v62 = vmul.f32 %v4254_v31, %v351_v47 }
 0x103   :  { %v216_v51 = vadd.f32 %v3688_v43, %v4247_v20  ;;  %v280_v52 = vadd.f32 %v3736_v44, %v4247_v20  ;;  %v3691_v53 = vadd.f32 %v3690_v48, %v3689_v45  ;;  %v3739_v54 = vadd.f32 %v3738_v49, %v3737_v46 }
 0x105   :  { %v336_v55 = vmax.f32 %v216_v51, 0.0  ;;  %v352_v56 = vmax.f32 %v280_v52, 0.0  ;;  %v283_v57 = vadd.f32 %v3739_v54, %v4247_v20  ;;  %407 = vadd.xlane.f32.xlu0 %v374_v50  ;;  %v219_v58 = vadd.f32 %v3691_v53, %v4247_v20 }
 0x107   :  { %v353_v59 = vmax.f32 %v283_v57, 0.0  ;;  %v3692_v60 = vpop.f32.mrb[8].mxu0  ;;  %v375_v61 = vmul.f32 %v4254_v31, %v336_v55  ;;  %v3740_v63 = vpop.f32.mrb[8].mxu1  ;;  %v391_v2 = vmul.f32 %v4254_v31, %v352_v56  ;;  %v337_v8 = vmax.f32 %v219_v58, 0.0 }
 0x108   :  { %v3693_v0 = vpop.f32.mrb[9].mxu0  ;;  %v3741_v1 = vpop.f32.mrb[9].mxu1 }
 0x109   :  { %v3694_v3 = vadd.f32 %v3693_v0, %v3692_v60  ;;  %409 = vadd.xlane.f32.xlu1 %v375_v61  ;;  %439 = vadd.xlane.f32.xlu0 %v390_v62  ;;  %v3695_v4 = vpop.f32.mrb[10].mxu0  ;;  %v3742_v5 = vadd.f32 %v3741_v1, %v3740_v63  ;;  %v392_v6 = vmul.f32 %v4254_v31, %v353_v59  ;;  %v3743_v7 = vpop.f32.mrb[10].mxu1 }
 0x10a   :  { %v3696_v9 = vpop.f32.mrb[11].mxu0  ;;  %v3744_v10 = vpop.f32.mrb[11].mxu1  ;;  %v376_v22 = vmul.f32 %v4254_v31, %v337_v8 }
 0x10b   :  { %v224_v11 = vadd.f32 %v3694_v3, %v4247_v20  ;;  %v3697_v12 = vadd.f32 %v3696_v9, %v3695_v4  ;;  %v288_v13 = vadd.f32 %v3742_v5, %v4247_v20  ;;  %v3745_v14 = vadd.f32 %v3744_v10, %v3743_v7 }
 0x10d   :  { %v338_v15 = vmax.f32 %v224_v11, 0.0  ;;  %v227_v16 = vadd.f32 %v3697_v12, %v4247_v20  ;;  %v354_v17 = vmax.f32 %v288_v13, 0.0  ;;  %441 = vadd.xlane.f32.xlu1 %v391_v2  ;;  %443 = vadd.xlane.f32.xlu0 %v392_v6  ;;  %v291_v18 = vadd.f32 %v3745_v14, %v4247_v20 }
 0x10f   :  { %v339_v19 = vmax.f32 %v227_v16, 0.0  ;;  %v3698_v21 = vpop.f32.mrb[12].mxu0  ;;  %v377_v23 = vmul.f32 %v4254_v31, %v338_v15  ;;  %v3746_v24 = vpop.f32.mrb[12].mxu1  ;;  %v355_v25 = vmax.f32 %v291_v18, 0.0  ;;  %v393_v28 = vmul.f32 %v4254_v31, %v354_v17 }
 0x110   :  { %v3699_v26 = vpop.f32.mrb[13].mxu0  ;;  %v3747_v27 = vpop.f32.mrb[13].mxu1 }
 0x111   :  { %v3700_v29 = vadd.f32 %v3699_v26, %v3698_v21  ;;  %411 = vadd.xlane.f32.xlu1 %v376_v22  ;;  %413 = vadd.xlane.f32.xlu0 %v377_v23  ;;  %v3701_v30 = vpop.f32.mrb[14].mxu0  ;;  %v3748_v32 = vadd.f32 %v3747_v27, %v3746_v24  ;;  %v378_v33 = vmul.f32 %v4254_v31, %v339_v19  ;;  %v3749_v34 = vpop.f32.mrb[14].mxu1 }
 0x112   :  { %v3702_v35 = vpop.f32.mrb[15].mxu0  ;;  %v3750_v36 = vpop.f32.mrb[15].mxu1  ;;  %v394_v41 = vmul.f32 %v4254_v31, %v355_v25 }
 0x113   :  { %v232_v37 = vadd.f32 %v3700_v29, %v4247_v20  ;;  %v3703_v38 = vadd.f32 %v3702_v35, %v3701_v30  ;;  %v296_v39 = vadd.f32 %v3748_v32, %v4247_v20  ;;  %v3751_v40 = vadd.f32 %v3750_v36, %v3749_v34 }
 0x115   :  { %v340_v42 = vmax.f32 %v232_v37, 0.0  ;;  %v235_v43 = vadd.f32 %v3703_v38, %v4247_v20  ;;  %v356_v44 = vmax.f32 %v296_v39, 0.0  ;;  %445 = vadd.xlane.f32.xlu1 %v393_v28  ;;  %415 = vadd.xlane.f32.xlu0 %v378_v33  ;;  %v299_v45 = vadd.f32 %v3751_v40, %v4247_v20 }
 0x117   :  { %v341_v46 = vmax.f32 %v235_v43, 0.0  ;;  %v3704_v47 = vpop.f32.mrb[16].mxu0  ;;  %v379_v48 = vmul.f32 %v4254_v31, %v340_v42  ;;  %v3752_v49 = vpop.f32.mrb[16].mxu1  ;;  %v357_v51 = vmax.f32 %v299_v45, 0.0  ;;  %v395_v53 = vmul.f32 %v4254_v31, %v356_v44 }
 0x118   :  { %v3705_v50 = vpop.f32.mrb[17].mxu0  ;;  %v3753_v52 = vpop.f32.mrb[17].mxu1 }
 0x119   :  { %v3706_v54 = vadd.f32 %v3705_v50, %v3704_v47  ;;  %447 = vadd.xlane.f32.xlu1 %v394_v41  ;;  %417 = vadd.xlane.f32.xlu0 %v379_v48  ;;  %v3707_v55 = vpop.f32.mrb[18].mxu0  ;;  %v3754_v56 = vadd.f32 %v3753_v52, %v3752_v49  ;;  %v380_v57 = vmul.f32 %v4254_v31, %v341_v46  ;;  %v3755_v58 = vpop.f32.mrb[18].mxu1 }
 0x11a   :  { %v3708_v59 = vpop.f32.mrb[19].mxu0  ;;  %v3756_v60 = vpop.f32.mrb[19].mxu1  ;;  %v396_v1 = vmul.f32 %v4254_v31, %v357_v51 }
 0x11b   :  { %v240_v61 = vadd.f32 %v3706_v54, %v4247_v20  ;;  %v3709_v62 = vadd.f32 %v3708_v59, %v3707_v55  ;;  %v304_v63 = vadd.f32 %v3754_v56, %v4247_v20  ;;  %v3757_v0 = vadd.f32 %v3756_v60, %v3755_v58 }
 0x11d   :  { %v342_v2 = vmax.f32 %v240_v61, 0.0  ;;  %v243_v3 = vadd.f32 %v3709_v62, %v4247_v20  ;;  %v358_v4 = vmax.f32 %v304_v63, 0.0  ;;  %449 = vadd.xlane.f32.xlu1 %v395_v53  ;;  %419 = vadd.xlane.f32.xlu0 %v380_v57  ;;  %v307_v5 = vadd.f32 %v3757_v0, %v4247_v20 }
 0x11f   :  { %v343_v6 = vmax.f32 %v243_v3, 0.0  ;;  %v381_v7 = vmul.f32 %v4254_v31, %v342_v2  ;;  %v3758_v8 = vpop.f32.mrb[20].mxu1  ;;  %v3710_v9 = vpop.f32.mrb[20].mxu0  ;;  %v359_v10 = vmax.f32 %v307_v5, 0.0  ;;  %v397_v12 = vmul.f32 %v4254_v31, %v358_v4 }
 0x120   :  { %v3759_v11 = vpop.f32.mrb[21].mxu1  ;;  %v3711_v13 = vpop.f32.mrb[21].mxu0 }
 0x121   :  { %451 = vadd.xlane.f32.xlu1 %v396_v1  ;;  %421 = vadd.xlane.f32.xlu0 %v381_v7  ;;  %v3760_v14 = vadd.f32 %v3759_v11, %v3758_v8  ;;  %v382_v15 = vmul.f32 %v4254_v31, %v343_v6  ;;  %v3712_v16 = vadd.f32 %v3711_v13, %v3710_v9  ;;  %v3761_v17 = vpop.f32.mrb[22].mxu1  ;;  %v3713_v18 = vpop.f32.mrb[22].mxu0 }
 0x122   :  { %v3762_v19 = vpop.f32.mrb[23].mxu1  ;;  %v3714_v21 = vpop.f32.mrb[23].mxu0  ;;  %v398_v26 = vmul.f32 %v4254_v31, %v359_v10 }
 0x123   :  { %v312_v22 = vadd.f32 %v3760_v14, %v4247_v20  ;;  %v248_v23 = vadd.f32 %v3712_v16, %v4247_v20  ;;  %v3763_v24 = vadd.f32 %v3762_v19, %v3761_v17  ;;  %v3715_v25 = vadd.f32 %v3714_v21, %v3713_v18 }
 0x125   :  { %v360_v27 = vmax.f32 %v312_v22, 0.0  ;;  %453 = vadd.xlane.f32.xlu1 %v397_v12  ;;  %423 = vadd.xlane.f32.xlu0 %v382_v15  ;;  %v344_v28 = vmax.f32 %v248_v23, 0.0  ;;  %v315_v29 = vadd.f32 %v3763_v24, %v4247_v20  ;;  %v251_v30 = vadd.f32 %v3715_v25, %v4247_v20 }
 0x126   :  { %v3924_v23 = vmov 0  }
 0x127   :  { %v345_v32 = vmax.f32 %v251_v30, 0.0  ;;  %v3764_v33 = vpop.f32.mrb[24].mxu1  ;;  %v3716_v34 = vpop.f32.mrb[24].mxu0  ;;  %v383_v35 = vmul.f32 %v4254_v31, %v344_v28  ;;  %v361_v36 = vmax.f32 %v315_v29, 0.0  ;;  %v399_v40 = vmul.f32 %v4254_v31, %v360_v27  ;;  %3795 = vset.pattern.permute.xlu1 %v3924_v23  ;;  %3794 = vset.pattern.permute.xlu0 %v3924_v23 }
 0x128   :  { %v3765_v37 = vpop.f32.mrb[25].mxu1  ;;  %v3717_v38 = vpop.f32.mrb[25].mxu0 }
 0x129   :  { %455 = vadd.xlane.f32.xlu1 %v398_v26  ;;  %v3766_v39 = vadd.f32 %v3765_v37, %v3764_v33  ;;  %v3718_v41 = vadd.f32 %v3717_v38, %v3716_v34  ;;  %v3767_v42 = vpop.f32.mrb[26].mxu1  ;;  %425 = vadd.xlane.f32.xlu0 %v383_v35  ;;  %v3719_v43 = vpop.f32.mrb[26].mxu0  ;;  %v384_v46 = vmul.f32 %v4254_v31, %v345_v32 }
 0x12a   :  { %v3768_v44 = vpop.f32.mrb[27].mxu1  ;;  %v3720_v45 = vpop.f32.mrb[27].mxu0  ;;  %v400_v51 = vmul.f32 %v4254_v31, %v361_v36 }
 0x12b   :  { %v320_v47 = vadd.f32 %v3766_v39, %v4247_v20  ;;  %v256_v48 = vadd.f32 %v3718_v41, %v4247_v20  ;;  %v3769_v49 = vadd.f32 %v3768_v44, %v3767_v42  ;;  %v3721_v50 = vadd.f32 %v3720_v45, %v3719_v43 }
 0x12c   :  { %v727_v43 = vlaneseq }
 0x12d   :  { %v362_v52 = vmax.f32 %v320_v47, 0.0  ;;  %457 = vadd.xlane.f32.xlu1 %v399_v40  ;;  %v346_v53 = vmax.f32 %v256_v48, 0.0  ;;  %v323_v54 = vadd.f32 %v3769_v49, %v4247_v20  ;;  %v259_v55 = vadd.f32 %v3721_v50, %v4247_v20  ;;  %427 = vadd.xlane.f32.xlu0 %v384_v46 }
 0x12e   :  { %vm3623_vm15 = vcmp.lt.s32.totalorder %v727_v43, 256 }
 0x12f   :  { %v347_v56 = vmax.f32 %v259_v55, 0.0  ;;  %v3770_v57 = vpop.f32.mrb[28].mxu1  ;;  %v3722_v58 = vpop.f32.mrb[28].mxu0  ;;  %v385_v59 = vmul.f32 %v4254_v31, %v346_v53  ;;  %v363_v60 = vmax.f32 %v323_v54, 0.0  ;;  %v401_v0 = vmul.f32 %v4254_v31, %v362_v52 }
 0x130   :  { %v3771_v61 = vpop.f32.mrb[29].mxu1  ;;  %v3723_v62 = vpop.f32.mrb[29].mxu0  ;;  %v4333_v54 = vshrl.u32 %v727_v43, 7 }
 0x131   :  { %459 = vadd.xlane.f32.xlu1 %v400_v51  ;;  %v3772_v63 = vadd.f32 %v3771_v61, %v3770_v57  ;;  %v3724_v1 = vadd.f32 %v3723_v62, %v3722_v58  ;;  %v3773_v2 = vpop.f32.mrb[30].mxu1  ;;  %429 = vadd.xlane.f32.xlu0 %v385_v59  ;;  %v3725_v3 = vpop.f32.mrb[30].mxu0  ;;  %v386_v6 = vmul.f32 %v4254_v31, %v347_v56  ;;  %v3925_v61 = vmov 1966171168  }
 0x132   :  { %v3774_v4 = vpop.f32.mrb[31].mxu1  ;;  %v3726_v5 = vpop.f32.mrb[31].mxu0  ;;  %v402_v11 = vmul.f32 %v4254_v31, %v363_v60  ;;  %v1756_v62 = vunpack.c.l.s4 %v3925_v61 }
 0x133   :  { %v328_v7 = vadd.f32 %v3772_v63, %v4247_v20  ;;  %v264_v8 = vadd.f32 %v3724_v1, %v4247_v20  ;;  %v3775_v9 = vadd.f32 %v3774_v4, %v3773_v2  ;;  %v3727_v10 = vadd.f32 %v3726_v5, %v3725_v3 }
 0x134   :  { %v4338_v1 = vsub.s32 0, %v4333_v54  ;;  %v4341_v4 = vsub.s32 1, %v4333_v54  ;;  %v4344_v5 = vsub.s32 2, %v4333_v54 }
 0x135   :  { %v364_v12 = vmax.f32 %v328_v7, 0.0  ;;  %461 = vadd.xlane.f32.xlu1 %v401_v0  ;;  %v348_v13 = vmax.f32 %v264_v8, 0.0  ;;  %v331_v14 = vadd.f32 %v3775_v9, %v4247_v20  ;;  %v267_v15 = vadd.f32 %v3727_v10, %v4247_v20  ;;  %431 = vadd.xlane.f32.xlu0 %v386_v6 }
 0x136   :  { %v4321_v20 = vstv %s5266_s4 }
 0x137   :  { %v365_v16 = vmax.f32 %v331_v14, 0.0  ;;  %v349_v17 = vmax.f32 %v267_v15, 0.0  ;;  %v387_v18 = vmul.f32 %v4254_v31, %v348_v13  ;;  %v403_v19 = vmul.f32 %v4254_v31, %v364_v12 }
 0x138   :  { %v4349_v15 = vsub.s32 3, %v4333_v54 }
 0x139   :  { %463 = vadd.xlane.f32.xlu1 %v402_v11  ;;  %433 = vadd.xlane.f32.xlu0 %v387_v18  ;;  %v404_v21 = vmul.f32 %v4254_v31, %v365_v16  ;;  %v388_v22 = vmul.f32 %v4254_v31, %v349_v17  ;;  %v1757_v11 = vunpack.c.0.s8 %v1756_v62  ;;  %v4352_v16 = vsub.s32 4, %v4333_v54 }
 0x13a   :  { %v4355_v17 = vsub.s32 5, %v4333_v54 }
 0x13d   :  { %465 = vadd.xlane.f32.xlu1 %v403_v19  ;;  %435 = vadd.xlane.f32.xlu0 %v388_v22  ;;  %v4358_v22 = vsub.s32 6, %v4333_v54 }
 0x141   :  { %467 = vadd.xlane.f32.xlu1 %v404_v21 }
 0x18e   :  { %v438_v24 = vpop.xlane.xlu1 %437  ;;  %v406_v25 = vpop.xlane.xlu0 %405 }
 0x18f   :  { %v487_v26 = vadd.f32 %v4321_v20, %v438_v24  ;;  %v471_v27 = vadd.f32 %v4321_v20, %v406_v25 }
 0x191   :  { %v3648_v28 = vmul.f32 -1.442695, %v487_v26  ;;  %v3632_v29 = vmul.f32 -1.442695, %v471_v27  ;;  %v4361_v27 = vsub.s32 7, %v4333_v54 }
 0x192   :  { %v408_v31 = vpop.xlane.xlu0 %407 }
 0x193   :  { %3796 = vpow2.f32 %v3648_v28  ;;  %v472_v30 = vadd.f32 %v4321_v20, %v408_v31  ;;  %v4364_v28 = vsub.s32 %v1757_v11, %v4333_v54 }
 0x194   :  { %3798 = vpow2.f32 %v3632_v29 }
 0x195   :  { %v3633_v32 = vmul.f32 -1.442695, %v472_v30 }
 0x196   :  { %v410_v33 = vpop.xlane.xlu1 %409  ;;  %v440_v34 = vpop.xlane.xlu0 %439 }
 0x197   :  { %3800 = vpow2.f32 %v3633_v32  ;;  %v473_v35 = vadd.f32 %v4321_v20, %v410_v33  ;;  %v488_v36 = vadd.f32 %v4321_v20, %v440_v34 }
 0x199   :  { %v3634_v37 = vmul.f32 -1.442695, %v473_v35  ;;  %v3649_v38 = vmul.f32 -1.442695, %v488_v36 }
 0x19a   :  { %v442_v39 = vpop.xlane.xlu1 %441  ;;  %v444_v40 = vpop.xlane.xlu0 %443 }
 0x19b   :  { %3802 = vpow2.f32 %v3634_v37  ;;  %v489_v41 = vadd.f32 %v4321_v20, %v442_v39  ;;  %v490_v42 = vadd.f32 %v4321_v20, %v444_v40 }
 0x19c   :  { %3804 = vpow2.f32 %v3649_v38 }
 0x19d   :  { %v3797_v44 = vpop.eup %3796  ;;  %v3650_v45 = vmul.f32 -1.442695, %v489_v41  ;;  %v3651_v48 = vmul.f32 -1.442695, %v490_v42 }
 0x19e   :  { %v3799_v46 = vpop.eup %3798  ;;  %v615_v47 = vadd.f32 1.0, %v3797_v44  ;;  %v412_v49 = vpop.xlane.xlu1 %411 }
 0x19f   :  { %v414_v50 = vpop.xlane.xlu0 %413  ;;  %3806 = vpow2.f32 %v3650_v45  ;;  %v474_v51 = vadd.f32 %v4321_v20, %v412_v49  ;;  %v599_v53 = vadd.f32 1.0, %v3799_v46 }
 0x1a0   :  { %v475_v52 = vadd.f32 %v4321_v20, %v414_v50  ;;  %3808 = vrcp.f32 %v615_v47 }
 0x1a1   :  { %v3801_v55 = vpop.eup %3800  ;;  %v3635_v56 = vmul.f32 -1.442695, %v474_v51  ;;  %3810 = vpow2.f32 %v3651_v48 }
 0x1a2   :  { %v3636_v57 = vmul.f32 -1.442695, %v475_v52  ;;  %v600_v58 = vadd.f32 1.0, %v3801_v55  ;;  %v446_v59 = vpop.xlane.xlu1 %445 }
 0x1a3   :  { %v416_v60 = vpop.xlane.xlu0 %415  ;;  %3812 = vpow2.f32 %v3635_v56  ;;  %v491_v63 = vadd.f32 %v4321_v20, %v446_v59 }
 0x1a4   :  { %v476_v0 = vadd.f32 %v4321_v20, %v416_v60  ;;  %3814 = vrcp.f32 %v599_v53 }
 0x1a5   :  { %v3803_v2 = vpop.eup %3802  ;;  %3816 = vpow2.f32 %v3636_v57  ;;  %v3652_v3 = vmul.f32 -1.442695, %v491_v63 }
 0x1a6   :  { %v3805_v6 = vpop.eup %3804  ;;  %3818 = vrcp.f32 %v600_v58  ;;  %v601_v7 = vadd.f32 1.0, %v3803_v2  ;;  %v3637_v8 = vmul.f32 -1.442695, %v476_v0  ;;  %v448_v9 = vpop.xlane.xlu1 %447 }
 0x1a7   :  { %v418_v10 = vpop.xlane.xlu0 %417  ;;  %v616_v12 = vadd.f32 1.0, %v3805_v6  ;;  %3820 = vpow2.f32 %v3652_v3  ;;  %v492_v13 = vadd.f32 %v4321_v20, %v448_v9 }
 0x1a8   :  { %v477_v14 = vadd.f32 %v4321_v20, %v418_v10  ;;  %3822 = vrcp.f32 %v601_v7 }
 0x1a9   :  { %v3807_v18 = vpop.eup %3806  ;;  %3824 = vrcp.f32 %v616_v12  ;;  %v3653_v19 = vmul.f32 -1.442695, %v492_v13 }
 0x1aa   :  { %v3638_v21 = vmul.f32 -1.442695, %v477_v14  ;;  %v3809_v23 = vpop.eup %3808  ;;  %v617_v24 = vadd.f32 1.0, %v3807_v18  ;;  %3826 = vpow2.f32 %v3637_v8  ;;  %v450_v25 = vpop.xlane.xlu1 %449 }
 0x1ab   :  { %v420_v26 = vpop.xlane.xlu0 %419  ;;  %3828 = vpow2.f32 %v3653_v19  ;;  %v493_v29 = vadd.f32 %v4321_v20, %v450_v25  ;;  %v1242_v30 = vrot.slane %v3809_v23, %v4338_v1  ;;  %v3811_v32 = vpop.eup %3810  ;;  %v1246_v33 = vrot.slane %v3809_v23, %v4341_v4 }
 0x1ac   :  { %v478_v31 = vadd.f32 %v4321_v20, %v420_v26  ;;  %3830 = vrcp.f32 %v617_v24  ;;  %v1250_v34 = vrot.slane %v3809_v23, %v4344_v5  ;;  %v1254_v35 = vrot.slane %v3809_v23, %v4349_v15 }
 0x1ad   :  { %v3813_v36 = vpop.eup %3812  ;;  %v618_v37 = vadd.f32 1.0, %v3811_v32  ;;  %3832 = vpow2.f32 %v3638_v21  ;;  %v3654_v38 = vmul.f32 -1.442695, %v493_v29  ;;  %v1258_v45 = vrot.slane %v3809_v23, %v4352_v16 }
 0x1ae   :  { %v3639_v39 = vmul.f32 -1.442695, %v478_v31  ;;  %v4372_v40 = vpop.eup %3814  ;;  %v602_v41 = vadd.f32 1.0, %v3813_v36  ;;  %v452_v42 = vpop.xlane.xlu1 %451  ;;  %v1262_v46 = vrot.slane %v3809_v23, %v4355_v17  ;;  %v1266_v47 = vrot.slane %v3809_v23, %v4358_v22 }
 0x1af   :  { %v422_v44 = vpop.xlane.xlu0 %421  ;;  %v3817_v48 = vpop.eup %3816  ;;  %3834 = vrcp.f32 %v618_v37  ;;  %v494_v49 = vadd.f32 %v4321_v20, %v452_v42  ;;  %v1270_v51 = vrot.slane %v3809_v23, %v4361_v27  ;;  %v2535_v55 = vcombine.low %v1242_v30, %v1246_v33 }
 0x1b0   :  { %v479_v50 = vadd.f32 %v4321_v20, %v422_v44  ;;  %v4380_v52 = vpop.eup %3818  ;;  %3836 = vrcp.f32 %v602_v41  ;;  %v603_v53 = vadd.f32 1.0, %v3817_v48  ;;  %v2536_v56 = vcombine.low %v1250_v34, %v1254_v35 }
 0x1b1   :  { %v3821_v57 = vpop.eup %3820  ;;  %3838 = vpow2.f32 %v3654_v38  ;;  %v3655_v58 = vmul.f32 -1.442695, %v494_v49  ;;  %v2537_v60 = vcombine.low %v1258_v45, %v1262_v46  ;;  %v2538_v2 = vcombine.low %v1266_v47, %v1270_v51 }
 0x1b2   :  { %v3640_v59 = vmul.f32 -1.442695, %v479_v50  ;;  %v4382_v61 = vpop.eup %3822  ;;  %3840 = vrcp.f32 %v603_v53  ;;  %v619_v62 = vadd.f32 1.0, %v3821_v57  ;;  %v454_v63 = vpop.xlane.xlu1 %453  ;;  %v2545_v3 = vrot.slane %v2535_v55, %v4364_v28 }
 0x1b3   :  { %v424_v0 = vpop.xlane.xlu0 %423  ;;  %v4385_v6 = vpop.eup %3824  ;;  %3842 = vpow2.f32 %v3639_v39  ;;  %v495_v7 = vadd.f32 %v4321_v20, %v454_v63  ;;  %v2552_v9 = vrot.slane %v2536_v56, %v4364_v28  ;;  %v2559_v11 = vrot.slane %v2537_v60, %v4364_v28 }
 0x1b4   :  { %v480_v8 = vadd.f32 %v4321_v20, %v424_v0  ;;  %v3827_v10 = vpop.eup %3826  ;;  %3844 = vrcp.f32 %v619_v62  ;;  %v2566_v12 = vrot.slane %v2538_v2, %v4364_v28  ;;  %v730_v13 = vrot.slane %v4372_v40, %v4338_v1 }
 0x1b5   :  { %v3829_v14 = vpop.eup %3828  ;;  %v604_v18 = vadd.f32 1.0, %v3827_v10  ;;  %3846 = vpow2.f32 %v3655_v58  ;;  %v3656_v19 = vmul.f32 -1.442695, %v495_v7  ;;  %v2567_v26 = vcombine.low %v2545_v3, %v2552_v9 }
 0x1b6   :  { %v3641_v21 = vmul.f32 -1.442695, %v480_v8  ;;  %v4394_v23 = vpop.eup %3830  ;;  %v620_v24 = vadd.f32 1.0, %v3829_v14  ;;  %3848 = vpow2.f32 %v3640_v59  ;;  %v456_v25 = vpop.xlane.xlu1 %455  ;;  %v2568_v29 = vcombine.low %v2559_v11, %v2566_v12 }
 0x1b7   :  { %v3833_v31 = vpop.eup %3832  ;;  %3850 = vrcp.f32 %v604_v18  ;;  %v496_v30 = vadd.f32 %v4321_v20, %v456_v25  ;;  %v734_v32 = vrot.slane %v4372_v40, %v4341_v4  ;;  %v738_v33 = vrot.slane %v4372_v40, %v4344_v5 }
 0x1b8   :  { %3852 = vrcp.f32 %v620_v24  ;;  %v605_v34 = vadd.f32 1.0, %v3833_v31  ;;  %v2575_v35 = vrot.slane %v2567_v26, %v4364_v28  ;;  %v2582_v36 = vrot.slane %v2568_v29, %v4364_v28 }
 0x1b9   :  { %v4403_v37 = vpop.eup %3834  ;;  %3854 = vpow2.f32 %v3656_v19  ;;  %v3657_v38 = vmul.f32 -1.442695, %v496_v30  ;;  %v742_v39 = vrot.slane %v4372_v40, %v4349_v15  ;;  %v746_v41 = vrot.slane %v4372_v40, %v4352_v16 }
 0x1ba   :  { %v4409_v42 = vpop.eup %3836  ;;  %3856 = vrcp.f32 %v605_v34  ;;  %v2583_v44 = vcombine.low %v2575_v35, %v2582_v36  ;;  %v750_v45 = vrot.slane %v4372_v40, %v4355_v17  ;;  %v754_v46 = vrot.slane %v4372_v40, %v4358_v22  ;;  %v458_v47 = vpop.xlane.xlu1 %457 }
 0x1bb   :  { %v3839_v48 = vpop.eup %3838  ;;  %3858 = vpow2.f32 %v3641_v21  ;;  %v758_v49 = vrot.slane %v4372_v40, %v4361_v27  ;;  %v1751_v50 = vcombine.low %v730_v13, %v734_v32  ;;  %v1752_v51 = vcombine.low %v738_v33, %v742_v39 }
 0x1bc   :  { %v4417_v53 = vpop.eup %3840  ;;  %v621_v55 = vadd.f32 1.0, %v3839_v48  ;;  %3860 = vpow2.f32 %v3657_v38  ;;  %3368 = vperm.xlu1 %3795, %v2583_v44   ;;  %v1753_v56 = vcombine.low %v746_v41, %v750_v45  ;;  %v497_v57 = vadd.f32 %v4321_v20, %v458_v47  ;;  %v426_v38 = vpop.xlane.xlu0 %425 }
 0x1bd   :  { %v3843_v58 = vpop.eup %3842  ;;  %v1754_v59 = vcombine.low %v754_v46, %v758_v49  ;;  %v1761_v60 = vrot.slane %v1751_v50, %v4364_v28  ;;  %v1768_v62 = vrot.slane %v1752_v51, %v4364_v28  ;;  %v762_v63 = vrot.slane %v4380_v52, %v4338_v1 }
 0x1be   :  { %v4424_v40 = vpop.eup %3844  ;;  %3862 = vrcp.f32 %v621_v55  ;;  %v606_v0 = vadd.f32 1.0, %v3843_v58  ;;  %v1775_v2 = vrot.slane %v1753_v56, %v4364_v28  ;;  %v3658_v3 = vmul.f32 -1.442695, %v497_v57  ;;  %v460_v32 = vpop.xlane.xlu1 %459 }
 0x1bf   :  { %v3847_v7 = vpop.eup %3846  ;;  %v1782_v8 = vrot.slane %v1754_v59, %v4364_v28  ;;  %v1783_v9 = vcombine.low %v1761_v60, %v1768_v62  ;;  %v766_v10 = vrot.slane %v4380_v52, %v4341_v4  ;;  %v770_v11 = vrot.slane %v4380_v52, %v4344_v5 }
 0x1c0   :  { %v3849_v12 = vpop.eup %3848  ;;  %3864 = vrcp.f32 %v606_v0  ;;  %v622_v13 = vadd.f32 1.0, %v3847_v7  ;;  %v774_v14 = vrot.slane %v4380_v52, %v4349_v15  ;;  %v778_v18 = vrot.slane %v4380_v52, %v4352_v16 }
 0x1c1   :  { %v4436_v19 = vpop.eup %3850  ;;  %v607_v21 = vadd.f32 1.0, %v3849_v12  ;;  %v1784_v24 = vcombine.low %v1775_v2, %v1782_v8  ;;  %v1791_v25 = vrot.slane %v1783_v9, %v4364_v28  ;;  %3866 = vpow2.f32 %v3658_v3 }
 0x1c2   :  { %v4439_v26 = vpop.eup %3852  ;;  %3868 = vrcp.f32 %v622_v13  ;;  %v782_v29 = vrot.slane %v4380_v52, %v4355_v17  ;;  %v786_v31 = vrot.slane %v4380_v52, %v4358_v22  ;;  %v790_v30 = vrot.slane %v4380_v52, %v4361_v27 }
 0x1c3   :  { %v3855_v33 = vpop.eup %3854  ;;  %3870 = vrcp.f32 %v607_v21  ;;  %v1798_v34 = vrot.slane %v1784_v24, %v4364_v28  ;;  %v1800_v35 = vcombine.low %v762_v63, %v766_v10  ;;  %v1801_v36 = vcombine.low %v770_v11, %v774_v14 }
 0x1c4   :  { %v4448_v39 = vpop.eup %3856  ;;  %v623_v41 = vadd.f32 1.0, %v3855_v33  ;;  %v1802_v44 = vcombine.low %v778_v18, %v782_v29  ;;  %v1803_v45 = vcombine.low %v786_v31, %v790_v30  ;;  %v481_v46 = vadd.f32 %v4321_v20, %v426_v38 }
 0x1c5   :  { %v3859_v47 = vpop.eup %3858  ;;  %v1799_v48 = vcombine.low %v1791_v25, %v1798_v34  ;;  %v1810_v49 = vrot.slane %v1800_v35, %v4364_v28  ;;  %v1817_v52 = vrot.slane %v1801_v36, %v4364_v28  ;;  %v498_v50 = vadd.f32 %v4321_v20, %v460_v32 }
 0x1c6   :  { %v3861_v51 = vpop.eup %3860  ;;  %3872 = vrcp.f32 %v623_v41  ;;  %v608_v55 = vadd.f32 1.0, %v3859_v47  ;;  %v1824_v56 = vrot.slane %v1802_v44, %v4364_v28  ;;  %v1831_v57 = vrot.slane %v1803_v45, %v4364_v28  ;;  %v428_v45 = vpop.xlane.xlu0 %427 }
 0x1c7   :  { %v624_v58 = vadd.f32 1.0, %v3861_v51  ;;  %3320 = vperm.xlu0 %3794, %v1799_v48   ;;  %v1832_v59 = vcombine.low %v1810_v49, %v1817_v52  ;;  %v3642_v60 = vmul.f32 -1.442695, %v481_v46  ;;  %v3659_v62 = vmul.f32 -1.442695, %v498_v50  ;;  %v462_v52 = vpop.xlane.xlu1 %461 }
 0x1c8   :  { %v4456_v63 = vpop.eup %3862  ;;  %3874 = vrcp.f32 %v608_v55  ;;  %v1833_v0 = vcombine.low %v1824_v56, %v1831_v57  ;;  %v794_v2 = vrot.slane %v4382_v61, %v4338_v1  ;;  %v798_v3 = vrot.slane %v4382_v61, %v4341_v4 }
 0x1c9   :  { %3876 = vrcp.f32 %v624_v58  ;;  %v1840_v7 = vrot.slane %v1832_v59, %v4364_v28  ;;  %v802_v8 = vrot.slane %v4382_v61, %v4344_v5  ;;  %v806_v9 = vrot.slane %v4382_v61, %v4349_v15 }
 0x1ca   :  { %v4467_v10 = vpop.eup %3864  ;;  %v1847_v11 = vrot.slane %v1833_v0, %v4364_v28  ;;  %3878 = vpow2.f32 %v3642_v60  ;;  %v810_v12 = vrot.slane %v4382_v61, %v4352_v16  ;;  %v814_v13 = vrot.slane %v4382_v61, %v4355_v17 }
 0x1cb   :  { %v3867_v14 = vpop.eup %3866  ;;  %3880 = vpow2.f32 %v3659_v62  ;;  %v818_v18 = vrot.slane %v4382_v61, %v4358_v22  ;;  %v822_v21 = vrot.slane %v4382_v61, %v4361_v27  ;;  %v1849_v24 = vcombine.low %v794_v2, %v798_v3 }
 0x1cc   :  { %v4478_v25 = vpop.eup %3868  ;;  %v625_v29 = vadd.f32 1.0, %v3867_v14  ;;  %v1848_v31 = vcombine.low %v1840_v7, %v1847_v11  ;;  %v1850_v30 = vcombine.low %v802_v8, %v806_v9  ;;  %v1851_v32 = vcombine.low %v810_v12, %v814_v13 }
 0x1cd   :  { %v4480_v33 = vpop.eup %3870  ;;  %v1852_v34 = vcombine.low %v818_v18, %v822_v21  ;;  %v1859_v35 = vrot.slane %v1849_v24, %v4364_v28  ;;  %v1274_v36 = vrot.slane %v4385_v6, %v4338_v1  ;;  %v1278_v38 = vrot.slane %v4385_v6, %v4341_v4 }
 0x1ce   :  { %3882 = vrcp.f32 %v625_v29  ;;  %3323 = vperm.xlu1 %3795, %v1848_v31   ;;  %v1866_v61 = vrot.slane %v1850_v30, %v4364_v28  ;;  %v1873_v41 = vrot.slane %v1851_v32, %v4364_v28  ;;  %v1282_v44 = vrot.slane %v4385_v6, %v4344_v5 }
 0x1cf   :  { %v1880_v46 = vrot.slane %v1852_v34, %v4364_v28  ;;  %v1286_v47 = vrot.slane %v4385_v6, %v4349_v15  ;;  %v1290_v48 = vrot.slane %v4385_v6, %v4352_v16  ;;  %v1294_v49 = vrot.slane %v4385_v6, %v4355_v17 }
 0x1d0   :  { %v4498_v50 = vpop.eup %3872  ;;  %v1881_v51 = vcombine.low %v1859_v35, %v1866_v61  ;;  %v1298_v55 = vrot.slane %v4385_v6, %v4358_v22  ;;  %v1302_v56 = vrot.slane %v4385_v6, %v4361_v27  ;;  %v2584_v57 = vcombine.low %v1274_v36, %v1278_v38 }
 0x1d1   :  { %v1882_v58 = vcombine.low %v1873_v41, %v1880_v46  ;;  %v2585_v59 = vcombine.low %v1282_v44, %v1286_v47  ;;  %v2586_v60 = vcombine.low %v1290_v48, %v1294_v49  ;;  %v482_v62 = vadd.f32 %v4321_v20, %v428_v45 }
 0x1d2   :  { %v4505_v0 = vpop.eup %3874  ;;  %v1889_v2 = vrot.slane %v1881_v51, %v4364_v28  ;;  %v2587_v3 = vcombine.low %v1298_v55, %v1302_v56  ;;  %v2594_v7 = vrot.slane %v2584_v57, %v4364_v28  ;;  %v499_v8 = vadd.f32 %v4321_v20, %v462_v52 }
 0x1d3   :  { %v4510_v9 = vpop.eup %3876  ;;  %v1896_v11 = vrot.slane %v1882_v58, %v4364_v28  ;;  %v2601_v6 = vrot.slane %v2585_v59, %v4364_v28  ;;  %v2608_v12 = vrot.slane %v2586_v60, %v4364_v28  ;;  %v3643_v13 = vmul.f32 -1.442695, %v482_v62 }
 0x1d4   :  { %v3879_v14 = vpop.eup %3878  ;;  %v2615_v18 = vrot.slane %v2587_v3, %v4364_v28  ;;  %v3660_v21 = vmul.f32 -1.442695, %v499_v8  ;;  %v1306_v24 = vrot.slane %v4394_v23, %v4338_v1  ;;  %v1310_v29 = vrot.slane %v4394_v23, %v4341_v4  ;;  %v464_v3 = vpop.xlane.xlu1 %463 }
 0x1d5   :  { %v3881_v31 = vpop.eup %3880  ;;  %v609_v30 = vadd.f32 1.0, %v3879_v14  ;;  %v1897_v32 = vcombine.low %v1889_v2, %v1896_v11  ;;  %v2616_v34 = vcombine.low %v2594_v7, %v2601_v6  ;;  %3884 = vpow2.f32 %v3643_v13 }
 0x1d6   :  { %v626_v35 = vadd.f32 1.0, %v3881_v31  ;;  %v2617_v36 = vcombine.low %v2608_v12, %v2615_v18  ;;  %3886 = vpow2.f32 %v3660_v21  ;;  %v1314_v38 = vrot.slane %v4394_v23, %v4344_v5  ;;  %v430_v21 = vpop.xlane.xlu0 %429 }
 0x1d7   :  { %3888 = vrcp.f32 %v609_v30  ;;  %3326 = vperm.xlu1 %3795, %v1897_v32   ;;  %v2624_v61 = vrot.slane %v2616_v34, %v4364_v28  ;;  %v1318_v41 = vrot.slane %v4394_v23, %v4349_v15  ;;  %v1322_v44 = vrot.slane %v4394_v23, %v4352_v16 }
 0x1d8   :  { %v4527_v45 = vpop.eup %3882  ;;  %3890 = vrcp.f32 %v626_v35  ;;  %v2631_v46 = vrot.slane %v2617_v36, %v4364_v28  ;;  %v1326_v47 = vrot.slane %v4394_v23, %v4355_v17  ;;  %v1330_v48 = vrot.slane %v4394_v23, %v4358_v22 }
 0x1d9   :  { %v1334_v49 = vrot.slane %v4394_v23, %v4361_v27  ;;  %v2633_v52 = vcombine.low %v1306_v24, %v1310_v29  ;;  %v2634_v51 = vcombine.low %v1314_v38, %v1318_v41  ;;  %v1338_v55 = vrot.slane %v4403_v37, %v4338_v1 }
 0x1da   :  { %v2632_v56 = vcombine.low %v2624_v61, %v2631_v46  ;;  %v2635_v57 = vcombine.low %v1322_v44, %v1326_v47  ;;  %v1342_v58 = vrot.slane %v4403_v37, %v4341_v4  ;;  %v1346_v59 = vrot.slane %v4403_v37, %v4344_v5 }
 0x1db   :  { %v2636_v60 = vcombine.low %v1330_v48, %v1334_v49  ;;  %v2643_v62 = vrot.slane %v2633_v52, %v4364_v28  ;;  %v2650_v2 = vrot.slane %v2634_v51, %v4364_v28  ;;  %v1350_v23 = vrot.slane %v4403_v37, %v4349_v15 }
 0x1dc   :  { %3371 = vperm.xlu0 %3794, %v2632_v56   ;;  %v2657_v7 = vrot.slane %v2635_v57, %v4364_v28  ;;  %v1354_v8 = vrot.slane %v4403_v37, %v4352_v16  ;;  %v1358_v11 = vrot.slane %v4403_v37, %v4355_v17  ;;  %v1362_v6 = vrot.slane %v4403_v37, %v4358_v22 }
 0x1dd   :  { %v2664_v12 = vrot.slane %v2636_v60, %v4364_v28  ;;  %v2665_v13 = vcombine.low %v2643_v62, %v2650_v2  ;;  %v1366_v14 = vrot.slane %v4403_v37, %v4361_v27  ;;  %v2682_v18 = vcombine.low %v1338_v55, %v1342_v58  ;;  %v432_v2 = vpop.xlane.xlu0 %431 }
 0x1de   :  { %v2683_v24 = vcombine.low %v1346_v59, %v1350_v23  ;;  %v2684_v29 = vcombine.low %v1354_v8, %v1358_v11  ;;  %v483_v31 = vadd.f32 %v4321_v20, %v430_v21  ;;  %v500_v30 = vadd.f32 %v4321_v20, %v464_v3  ;;  %v466_v8 = vpop.xlane.xlu1 %465 }
 0x1df   :  { %v3885_v32 = vpop.eup %3884  ;;  %v2666_v34 = vcombine.low %v2657_v7, %v2664_v12  ;;  %v2673_v35 = vrot.slane %v2665_v13, %v4364_v28  ;;  %v2685_v36 = vcombine.low %v1362_v6, %v1366_v14  ;;  %v2692_v38 = vrot.slane %v2682_v18, %v4364_v28 }
 0x1e0   :  { %v3887_v61 = vpop.eup %3886  ;;  %v610_v41 = vadd.f32 1.0, %v3885_v32  ;;  %v2699_v44 = vrot.slane %v2683_v24, %v4364_v28  ;;  %v2706_v37 = vrot.slane %v2684_v29, %v4364_v28  ;;  %v3644_v46 = vmul.f32 -1.442695, %v483_v31 }
 0x1e1   :  { %v4562_v47 = vpop.eup %3888  ;;  %v627_v48 = vadd.f32 1.0, %v3887_v61  ;;  %v2680_v49 = vrot.slane %v2666_v34, %v4364_v28  ;;  %v2713_v52 = vrot.slane %v2685_v36, %v4364_v28  ;;  %v3661_v51 = vmul.f32 -1.442695, %v500_v30 }
 0x1e2   :  { %v4566_v55 = vpop.eup %3890  ;;  %3892 = vrcp.f32 %v610_v41  ;;  %v2714_v56 = vcombine.low %v2692_v38, %v2699_v44  ;;  %v826_v57 = vrot.slane %v4409_v42, %v4338_v1  ;;  %v830_v58 = vrot.slane %v4409_v42, %v4341_v4 }
 0x1e3   :  { %3894 = vrcp.f32 %v627_v48  ;;  %v2681_v59 = vcombine.low %v2673_v35, %v2680_v49  ;;  %v2715_v60 = vcombine.low %v2706_v37, %v2713_v52  ;;  %v834_v62 = vrot.slane %v4409_v42, %v4344_v5  ;;  %v468_v48 = vpop.xlane.xlu1 %467 }
 0x1e4   :  { %v2722_v23 = vrot.slane %v2714_v56, %v4364_v28  ;;  %3896 = vpow2.f32 %v3644_v46  ;;  %v838_v3 = vrot.slane %v4409_v42, %v4349_v15  ;;  %v842_v7 = vrot.slane %v4409_v42, %v4352_v16 }
 0x1e5   :  { %3374 = vperm.xlu1 %3795, %v2681_v59   ;;  %v2729_v11 = vrot.slane %v2715_v60, %v4364_v28  ;;  %3898 = vpow2.f32 %v3661_v51  ;;  %v846_v6 = vrot.slane %v4409_v42, %v4355_v17  ;;  %v850_v12 = vrot.slane %v4409_v42, %v4358_v22 }
 0x1e6   :  { %v854_v13 = vrot.slane %v4409_v42, %v4361_v27  ;;  %v1898_v14 = vcombine.low %v826_v57, %v830_v58  ;;  %v1899_v18 = vcombine.low %v834_v62, %v838_v3  ;;  %v484_v21 = vadd.f32 %v4321_v20, %v432_v2  ;;  %v434_v62 = vpop.xlane.xlu0 %433 }
 0x1e7   :  { %v2730_v24 = vcombine.low %v2722_v23, %v2729_v11  ;;  %v1900_v29 = vcombine.low %v842_v7, %v846_v6  ;;  %v501_v31 = vadd.f32 %v4321_v20, %v466_v8  ;;  %v858_v30 = vrot.slane %v4417_v53, %v4338_v1 }
 0x1e8   :  { %v1901_v32 = vcombine.low %v850_v12, %v854_v13  ;;  %v1908_v34 = vrot.slane %v1898_v14, %v4364_v28  ;;  %v1915_v35 = vrot.slane %v1899_v18, %v4364_v28  ;;  %v3645_v36 = vmul.f32 -1.442695, %v484_v21 }
 0x1e9   :  { %3377 = vperm.xlu0 %3794, %v2730_v24   ;;  %v1922_v42 = vrot.slane %v1900_v29, %v4364_v28  ;;  %v3662_v38 = vmul.f32 -1.442695, %v501_v31  ;;  %v862_v61 = vrot.slane %v4417_v53, %v4341_v4  ;;  %v866_v41 = vrot.slane %v4417_v53, %v4344_v5 }
 0x1ea   :  { %v1929_v44 = vrot.slane %v1901_v32, %v4364_v28  ;;  %v1930_v37 = vcombine.low %v1908_v34, %v1915_v35  ;;  %3900 = vpow2.f32 %v3645_v36  ;;  %v870_v46 = vrot.slane %v4417_v53, %v4349_v15 }
 0x1eb   :  { %3902 = vpow2.f32 %v3662_v38  ;;  %v874_v49 = vrot.slane %v4417_v53, %v4352_v16  ;;  %v878_v52 = vrot.slane %v4417_v53, %v4355_v17  ;;  %v882_v51 = vrot.slane %v4417_v53, %v4358_v22 }
 0x1ec   :  { %v4606_v56 = vpop.eup %3892  ;;  %v1931_v57 = vcombine.low %v1922_v42, %v1929_v44  ;;  %v1938_v58 = vrot.slane %v1930_v37, %v4364_v28  ;;  %v886_v59 = vrot.slane %v4417_v53, %v4361_v27  ;;  %v1947_v60 = vcombine.low %v858_v30, %v862_v61 }
 0x1ed   :  { %v4611_v2 = vpop.eup %3894  ;;  %v1948_v23 = vcombine.low %v866_v41, %v870_v46  ;;  %v1949_v3 = vcombine.low %v874_v49, %v878_v52  ;;  %v485_v7 = vadd.f32 %v4321_v20, %v434_v62  ;;  %v502_v8 = vadd.f32 %v4321_v20, %v468_v48 }
 0x1ee   :  { %v3897_v11 = vpop.eup %3896  ;;  %v1945_v6 = vrot.slane %v1931_v57, %v4364_v28  ;;  %v1950_v12 = vcombine.low %v882_v51, %v886_v59  ;;  %v1957_v13 = vrot.slane %v1947_v60, %v4364_v28  ;;  %v1402_v14 = vrot.slane %v4439_v26, %v4338_v1 }
 0x1ef   :  { %v3899_v53 = vpop.eup %3898  ;;  %v611_v18 = vadd.f32 1.0, %v3897_v11  ;;  %v1964_v21 = vrot.slane %v1948_v23, %v4364_v28  ;;  %v1971_v24 = vrot.slane %v1949_v3, %v4364_v28  ;;  %v3646_v29 = vmul.f32 -1.442695, %v485_v7 }
 0x1f0   :  { %v628_v31 = vadd.f32 1.0, %v3899_v53  ;;  %v1946_v30 = vcombine.low %v1938_v58, %v1945_v6  ;;  %v1978_v32 = vrot.slane %v1950_v12, %v4364_v28  ;;  %v3663_v34 = vmul.f32 -1.442695, %v502_v8  ;;  %v436_v53 = vpop.xlane.xlu0 %435 }
 0x1f1   :  { %3904 = vrcp.f32 %v611_v18  ;;  %v1979_v35 = vcombine.low %v1957_v13, %v1964_v21  ;;  %v1406_v36 = vrot.slane %v4439_v26, %v4341_v4  ;;  %v1410_v42 = vrot.slane %v4439_v26, %v4344_v5 }
 0x1f2   :  { %3906 = vrcp.f32 %v628_v31  ;;  %3329 = vperm.xlu1 %3795, %v1946_v30   ;;  %v1980_v38 = vcombine.low %v1971_v24, %v1978_v32  ;;  %v1414_v61 = vrot.slane %v4439_v26, %v4349_v15  ;;  %v1418_v41 = vrot.slane %v4439_v26, %v4352_v16 }
 0x1f3   :  { %v1987_v44 = vrot.slane %v1979_v35, %v4364_v28  ;;  %3908 = vpow2.f32 %v3646_v29  ;;  %v1422_v37 = vrot.slane %v4439_v26, %v4355_v17  ;;  %v1426_v46 = vrot.slane %v4439_v26, %v4358_v22 }
 0x1f4   :  { %v3901_v48 = vpop.eup %3900  ;;  %v1994_v49 = vrot.slane %v1980_v38, %v4364_v28  ;;  %3910 = vpow2.f32 %v3663_v34  ;;  %v1430_v52 = vrot.slane %v4439_v26, %v4361_v27  ;;  %v2780_v51 = vcombine.low %v1402_v14, %v1406_v36 }
 0x1f5   :  { %v3903_v57 = vpop.eup %3902  ;;  %v612_v58 = vadd.f32 1.0, %v3901_v48  ;;  %v2781_v59 = vcombine.low %v1410_v42, %v1414_v61  ;;  %v2782_v60 = vcombine.low %v1418_v41, %v1422_v37  ;;  %v1370_v62 = vrot.slane %v4424_v40, %v4338_v1 }
 0x1f6   :  { %v629_v23 = vadd.f32 1.0, %v3903_v57  ;;  %v1995_v3 = vcombine.low %v1987_v44, %v1994_v49  ;;  %v2783_v7 = vcombine.low %v1426_v46, %v1430_v52  ;;  %v2790_v8 = vrot.slane %v2780_v51, %v4364_v28 }
 0x1f7   :  { %3912 = vrcp.f32 %v612_v58  ;;  %v2797_v11 = vrot.slane %v2781_v59, %v4364_v28  ;;  %v2804_v6 = vrot.slane %v2782_v60, %v4364_v28  ;;  %v1374_v26 = vrot.slane %v4424_v40, %v4341_v4 }
 0x1f8   :  { %3914 = vrcp.f32 %v629_v23  ;;  %3332 = vperm.xlu1 %3795, %v1995_v3   ;;  %v2811_v12 = vrot.slane %v2783_v7, %v4364_v28  ;;  %v1378_v13 = vrot.slane %v4424_v40, %v4344_v5  ;;  %v1382_v14 = vrot.slane %v4424_v40, %v4349_v15 }
 0x1f9   :  { %v2812_v18 = vcombine.low %v2790_v8, %v2797_v11  ;;  %v1386_v21 = vrot.slane %v4424_v40, %v4352_v16  ;;  %v1390_v24 = vrot.slane %v4424_v40, %v4355_v17  ;;  %v1394_v29 = vrot.slane %v4424_v40, %v4358_v22 }
 0x1fa   :  { %v2813_v31 = vcombine.low %v2804_v6, %v2811_v12  ;;  %v1398_v30 = vrot.slane %v4424_v40, %v4361_v27  ;;  %v2731_v32 = vcombine.low %v1370_v62, %v1374_v26  ;;  %v2732_v34 = vcombine.low %v1378_v13, %v1382_v14 }
 0x1fb   :  { %v4658_v35 = vpop.eup %3904  ;;  %v2820_v36 = vrot.slane %v2812_v18, %v4364_v28  ;;  %v2733_v42 = vcombine.low %v1386_v21, %v1390_v24  ;;  %v486_v38 = vadd.f32 %v4321_v20, %v436_v53  ;;  %v890_v61 = vrot.slane %v4436_v19, %v4338_v1 }
 0x1fc   :  { %v4664_v41 = vpop.eup %3906  ;;  %v2827_v44 = vrot.slane %v2813_v31, %v4364_v28  ;;  %v2734_v37 = vcombine.low %v1394_v29, %v1398_v30  ;;  %v2741_v46 = vrot.slane %v2731_v32, %v4364_v28  ;;  %v2748_v40 = vrot.slane %v2732_v34, %v4364_v28 }
 0x1fd   :  { %v3909_v48 = vpop.eup %3908  ;;  %v2755_v49 = vrot.slane %v2733_v42, %v4364_v28  ;;  %v3647_v52 = vmul.f32 -1.442695, %v486_v38  ;;  %v894_v51 = vrot.slane %v4436_v19, %v4341_v4  ;;  %v898_v20 = vrot.slane %v4436_v19, %v4344_v5 }
 0x1fe   :  { %v3911_v57 = vpop.eup %3910  ;;  %v613_v58 = vadd.f32 1.0, %v3909_v48  ;;  %v2828_v59 = vcombine.low %v2820_v36, %v2827_v44  ;;  %v2762_v60 = vrot.slane %v2734_v37, %v4364_v28  ;;  %v2763_v62 = vcombine.low %v2741_v46, %v2748_v40 }
 0x1ff   :  { %v630_v23 = vadd.f32 1.0, %v3911_v57  ;;  %3916 = vpow2.f32 %v3647_v52  ;;  %v902_v3 = vrot.slane %v4436_v19, %v4349_v15  ;;  %v906_v7 = vrot.slane %v4436_v19, %v4352_v16 }
 0x200   :  { %3918 = vrcp.f32 %v613_v58  ;;  %3383 = vperm.xlu0 %3794, %v2828_v59   ;;  %v2764_v8 = vcombine.low %v2755_v49, %v2762_v60  ;;  %v2771_v11 = vrot.slane %v2763_v62, %v4364_v28  ;;  %v910_v6 = vrot.slane %v4436_v19, %v4355_v17 }
 0x201   :  { %v4682_v26 = vpop.eup %3912  ;;  %3920 = vrcp.f32 %v630_v23  ;;  %v914_v12 = vrot.slane %v4436_v19, %v4358_v22  ;;  %v918_v13 = vrot.slane %v4436_v19, %v4361_v27  ;;  %v1996_v14 = vcombine.low %v890_v61, %v894_v51 }
 0x202   :  { %v4688_v53 = vpop.eup %3914  ;;  %v2778_v18 = vrot.slane %v2764_v8, %v4364_v28  ;;  %v1997_v21 = vcombine.low %v898_v20, %v902_v3  ;;  %v1998_v24 = vcombine.low %v906_v7, %v910_v6  ;;  %v1466_v29 = vrot.slane %v4478_v25, %v4338_v1 }
 0x203   :  { %v1999_v31 = vcombine.low %v914_v12, %v918_v13  ;;  %v2006_v30 = vrot.slane %v1996_v14, %v4364_v28  ;;  %v1470_v32 = vrot.slane %v4478_v25, %v4341_v4  ;;  %v1474_v34 = vrot.slane %v4478_v25, %v4344_v5 }
 0x204   :  { %v2779_v19 = vcombine.low %v2771_v11, %v2778_v18  ;;  %v2013_v36 = vrot.slane %v1997_v21, %v4364_v28  ;;  %v2020_v42 = vrot.slane %v1998_v24, %v4364_v28  ;;  %v1478_v38 = vrot.slane %v4478_v25, %v4349_v15 }
 0x205   :  { %v2027_v61 = vrot.slane %v1999_v31, %v4364_v28  ;;  %v1482_v44 = vrot.slane %v4478_v25, %v4352_v16  ;;  %v1486_v37 = vrot.slane %v4478_v25, %v4355_v17  ;;  %v1490_v46 = vrot.slane %v4478_v25, %v4358_v22 }
 0x206   :  { %3380 = vperm.xlu1 %3795, %v2779_v19   ;;  %v2028_v40 = vcombine.low %v2006_v30, %v2013_v36  ;;  %v1494_v48 = vrot.slane %v4478_v25, %v4361_v27  ;;  %v2878_v49 = vcombine.low %v1466_v29, %v1470_v32  ;;  %v2879_v52 = vcombine.low %v1474_v34, %v1478_v38 }
 0x207   :  { %v2029_v51 = vcombine.low %v2020_v42, %v2027_v61  ;;  %v2880_v20 = vcombine.low %v1482_v44, %v1486_v37  ;;  %v922_v57 = vrot.slane %v4448_v39, %v4338_v1  ;;  %v926_v58 = vrot.slane %v4448_v39, %v4341_v4 }
 0x208   :  { %v2036_v59 = vrot.slane %v2028_v40, %v4364_v28  ;;  %v2881_v60 = vcombine.low %v1490_v46, %v1494_v48  ;;  %v2888_v62 = vrot.slane %v2878_v49, %v4364_v28  ;;  %v2895_v23 = vrot.slane %v2879_v52, %v4364_v28 }
 0x209   :  { %v3917_v3 = vpop.eup %3916  ;;  %v2043_v25 = vrot.slane %v2029_v51, %v4364_v28  ;;  %v2902_v7 = vrot.slane %v2880_v20, %v4364_v28  ;;  %v930_v8 = vrot.slane %v4448_v39, %v4344_v5  ;;  %v934_v11 = vrot.slane %v4448_v39, %v4349_v15 }
 0x20a   :  { %v4724_v6 = vpop.eup %3918  ;;  %v614_v12 = vadd.f32 1.0, %v3917_v3  ;;  %v2909_v13 = vrot.slane %v2881_v60, %v4364_v28  ;;  %v2910_v14 = vcombine.low %v2888_v62, %v2895_v23  ;;  %v938_v18 = vrot.slane %v4448_v39, %v4352_v16 }
 0x20b   :  { %v4729_v21 = vpop.eup %3920  ;;  %v2044_v24 = vcombine.low %v2036_v59, %v2043_v25  ;;  %v942_v29 = vrot.slane %v4448_v39, %v4355_v17  ;;  %v946_v31 = vrot.slane %v4448_v39, %v4358_v22  ;;  %v950_v30 = vrot.slane %v4448_v39, %v4361_v27 }
 0x20c   :  { %3922 = vrcp.f32 %v614_v12  ;;  %v2911_v32 = vcombine.low %v2902_v7, %v2909_v13  ;;  %v2918_v34 = vrot.slane %v2910_v14, %v4364_v28  ;;  %v2045_v19 = vcombine.low %v922_v57, %v926_v58 }
 0x20d   :  { %3335 = vperm.xlu1 %3795, %v2044_v24   ;;  %v2046_v36 = vcombine.low %v930_v8, %v934_v11  ;;  %v2047_v42 = vcombine.low %v938_v18, %v942_v29  ;;  %v2048_v38 = vcombine.low %v946_v31, %v950_v30  ;;  %v1434_v61 = vrot.slane %v4456_v63, %v4338_v1 }
 0x20e   :  { %v2925_v44 = vrot.slane %v2911_v32, %v4364_v28  ;;  %v2055_v37 = vrot.slane %v2045_v19, %v4364_v28  ;;  %v1438_v46 = vrot.slane %v4456_v63, %v4341_v4  ;;  %v1442_v39 = vrot.slane %v4456_v63, %v4344_v5 }
 0x20f   :  { %v2062_v40 = vrot.slane %v2046_v36, %v4364_v28  ;;  %v2069_v48 = vrot.slane %v2047_v42, %v4364_v28  ;;  %v2076_v49 = vrot.slane %v2048_v38, %v4364_v28  ;;  %v1446_v52 = vrot.slane %v4456_v63, %v4349_v15 }
 0x210   :  { %v2926_v51 = vcombine.low %v2918_v34, %v2925_v44  ;;  %v1450_v20 = vrot.slane %v4456_v63, %v4352_v16  ;;  %v1454_v57 = vrot.slane %v4456_v63, %v4355_v17  ;;  %v1458_v58 = vrot.slane %v4456_v63, %v4358_v22 }
 0x211   :  { %v2077_v59 = vcombine.low %v2055_v37, %v2062_v40  ;;  %v2078_v60 = vcombine.low %v2069_v48, %v2076_v49  ;;  %v1462_v62 = vrot.slane %v4456_v63, %v4361_v27  ;;  %v2829_v23 = vcombine.low %v1434_v61, %v1438_v46 }
 0x212   :  { %3389 = vperm.xlu0 %3794, %v2926_v51   ;;  %v2830_v3 = vcombine.low %v1442_v39, %v1446_v52  ;;  %v2831_v25 = vcombine.low %v1450_v20, %v1454_v57  ;;  %v1018_v7 = vrot.slane %v4505_v0, %v4338_v1  ;;  %v1022_v8 = vrot.slane %v4505_v0, %v4341_v4 }
 0x213   :  { %v2085_v11 = vrot.slane %v2077_v59, %v4364_v28  ;;  %v2092_v12 = vrot.slane %v2078_v60, %v4364_v28  ;;  %v2832_v13 = vcombine.low %v1458_v58, %v1462_v62  ;;  %v2839_v14 = vrot.slane %v2829_v23, %v4364_v28 }
 0x214   :  { %v2846_v18 = vrot.slane %v2830_v3, %v4364_v28  ;;  %v2853_v63 = vrot.slane %v2831_v25, %v4364_v28  ;;  %v1026_v24 = vrot.slane %v4505_v0, %v4344_v5  ;;  %v1030_v29 = vrot.slane %v4505_v0, %v4349_v15 }
 0x215   :  { %v2093_v31 = vcombine.low %v2085_v11, %v2092_v12  ;;  %v2860_v30 = vrot.slane %v2832_v13, %v4364_v28  ;;  %v1034_v32 = vrot.slane %v4505_v0, %v4352_v16  ;;  %v1038_v34 = vrot.slane %v4505_v0, %v4355_v17 }
 0x216   :  { %v4777_v19 = vpop.eup %3922  ;;  %v2861_v36 = vcombine.low %v2839_v14, %v2846_v18  ;;  %v1042_v42 = vrot.slane %v4505_v0, %v4358_v22  ;;  %v1046_v38 = vrot.slane %v4505_v0, %v4361_v27  ;;  %v2192_v61 = vcombine.low %v1018_v7, %v1022_v8 }
 0x217   :  { %3338 = vperm.xlu1 %3795, %v2093_v31   ;;  %v2862_v44 = vcombine.low %v2853_v63, %v2860_v30  ;;  %v2193_v37 = vcombine.low %v1026_v24, %v1030_v29  ;;  %v2194_v46 = vcombine.low %v1034_v32, %v1038_v34  ;;  %v954_v39 = vrot.slane %v4467_v10, %v4338_v1 }
 0x218   :  { %v2869_v40 = vrot.slane %v2861_v36, %v4364_v28  ;;  %v2195_v48 = vcombine.low %v1042_v42, %v1046_v38  ;;  %v2202_v49 = vrot.slane %v2192_v61, %v4364_v28  ;;  %v958_v52 = vrot.slane %v4467_v10, %v4341_v4 }
 0x219   :  { %v2876_v51 = vrot.slane %v2862_v44, %v4364_v28  ;;  %v2209_v0 = vrot.slane %v2193_v37, %v4364_v28  ;;  %v2216_v20 = vrot.slane %v2194_v46, %v4364_v28  ;;  %v962_v57 = vrot.slane %v4467_v10, %v4344_v5 }
 0x21a   :  { %v2223_v58 = vrot.slane %v2195_v48, %v4364_v28  ;;  %v966_v59 = vrot.slane %v4467_v10, %v4349_v15  ;;  %v970_v60 = vrot.slane %v4467_v10, %v4352_v16  ;;  %v974_v62 = vrot.slane %v4467_v10, %v4355_v17 }
 0x21b   :  { %v2877_v23 = vcombine.low %v2869_v40, %v2876_v51  ;;  %v2224_v3 = vcombine.low %v2202_v49, %v2209_v0  ;;  %v978_v25 = vrot.slane %v4467_v10, %v4358_v22  ;;  %v982_v7 = vrot.slane %v4467_v10, %v4361_v27 }
 0x21c   :  { %v2225_v8 = vcombine.low %v2216_v20, %v2223_v58  ;;  %v2094_v11 = vcombine.low %v954_v39, %v958_v52  ;;  %v2095_v12 = vcombine.low %v962_v57, %v966_v59  ;;  %v2096_v13 = vcombine.low %v970_v60, %v974_v62 }
 0x21d   :  { %3386 = vperm.xlu1 %3795, %v2877_v23   ;;  %v2232_v14 = vrot.slane %v2224_v3, %v4364_v28  ;;  %v2097_v18 = vcombine.low %v978_v25, %v982_v7  ;;  %v1530_v63 = vrot.slane %v4510_v9, %v4338_v1  ;;  %v1534_v24 = vrot.slane %v4510_v9, %v4341_v4 }
 0x21e   :  { %v2239_v29 = vrot.slane %v2225_v8, %v4364_v28  ;;  %v2104_v31 = vrot.slane %v2094_v11, %v4364_v28  ;;  %v2111_v10 = vrot.slane %v2095_v12, %v4364_v28  ;;  %v2118_v30 = vrot.slane %v2096_v13, %v4364_v28 }
 0x21f   :  { %v2125_v32 = vrot.slane %v2097_v18, %v4364_v28  ;;  %v1538_v34 = vrot.slane %v4510_v9, %v4344_v5  ;;  %v1542_v36 = vrot.slane %v4510_v9, %v4349_v15  ;;  %v1546_v42 = vrot.slane %v4510_v9, %v4352_v16 }
 0x220   :  { %v2240_v38 = vcombine.low %v2232_v14, %v2239_v29  ;;  %v2126_v61 = vcombine.low %v2104_v31, %v2111_v10  ;;  %v1550_v44 = vrot.slane %v4510_v9, %v4355_v17  ;;  %v1554_v37 = vrot.slane %v4510_v9, %v4358_v22 }
 0x221   :  { %v2127_v46 = vcombine.low %v2118_v30, %v2125_v32  ;;  %v1558_v39 = vrot.slane %v4510_v9, %v4361_v27  ;;  %v2976_v40 = vcombine.low %v1530_v63, %v1534_v24  ;;  %v2977_v48 = vcombine.low %v1538_v34, %v1542_v36 }
 0x222   :  { %3347 = vperm.xlu0 %3794, %v2240_v38   ;;  %v2134_v49 = vrot.slane %v2126_v61, %v4364_v28  ;;  %v2978_v52 = vcombine.low %v1546_v42, %v1550_v44  ;;  %v986_v51 = vrot.slane %v4480_v33, %v4338_v1  ;;  %v990_v0 = vrot.slane %v4480_v33, %v4341_v4 }
 0x223   :  { %v2141_v20 = vrot.slane %v2127_v46, %v4364_v28  ;;  %v2979_v57 = vcombine.low %v1554_v37, %v1558_v39  ;;  %v2986_v58 = vrot.slane %v2976_v40, %v4364_v28  ;;  %v2993_v59 = vrot.slane %v2977_v48, %v4364_v28 }
 0x224   :  { %v3000_v9 = vrot.slane %v2978_v52, %v4364_v28  ;;  %v994_v60 = vrot.slane %v4480_v33, %v4344_v5  ;;  %v998_v62 = vrot.slane %v4480_v33, %v4349_v15  ;;  %v1002_v23 = vrot.slane %v4480_v33, %v4352_v16 }
 0x225   :  { %v2142_v3 = vcombine.low %v2134_v49, %v2141_v20  ;;  %v3007_v25 = vrot.slane %v2979_v57, %v4364_v28  ;;  %v3008_v7 = vcombine.low %v2986_v58, %v2993_v59  ;;  %v1006_v8 = vrot.slane %v4480_v33, %v4355_v17 }
 0x226   :  { %v1010_v11 = vrot.slane %v4480_v33, %v4358_v22  ;;  %v1014_v12 = vrot.slane %v4480_v33, %v4361_v27  ;;  %v2143_v13 = vcombine.low %v986_v51, %v990_v0  ;;  %v2144_v14 = vcombine.low %v994_v60, %v998_v62 }
 0x227   :  { %3341 = vperm.xlu1 %3795, %v2142_v3   ;;  %v3009_v18 = vcombine.low %v3000_v9, %v3007_v25  ;;  %v3016_v63 = vrot.slane %v3008_v7, %v4364_v28  ;;  %v2145_v24 = vcombine.low %v1002_v23, %v1006_v8  ;;  %v1562_v29 = vrot.slane %v4527_v45, %v4338_v1 }
 0x228   :  { %v2146_v31 = vcombine.low %v1010_v11, %v1014_v12  ;;  %v2153_v10 = vrot.slane %v2143_v13, %v4364_v28  ;;  %v2160_v30 = vrot.slane %v2144_v14, %v4364_v28  ;;  %v1566_v32 = vrot.slane %v4527_v45, %v4341_v4 }
 0x229   :  { %v3023_v33 = vrot.slane %v3009_v18, %v4364_v28  ;;  %v2167_v34 = vrot.slane %v2145_v24, %v4364_v28  ;;  %v1570_v36 = vrot.slane %v4527_v45, %v4344_v5  ;;  %v1574_v42 = vrot.slane %v4527_v45, %v4349_v15 }
 0x22a   :  { %v2174_v38 = vrot.slane %v2146_v31, %v4364_v28  ;;  %v2175_v61 = vcombine.low %v2153_v10, %v2160_v30  ;;  %v1578_v44 = vrot.slane %v4527_v45, %v4352_v16  ;;  %v1582_v37 = vrot.slane %v4527_v45, %v4355_v17 }
 0x22b   :  { %v3024_v46 = vcombine.low %v3016_v63, %v3023_v33  ;;  %v1586_v39 = vrot.slane %v4527_v45, %v4358_v22  ;;  %v1590_v40 = vrot.slane %v4527_v45, %v4361_v27  ;;  %v3025_v48 = vcombine.low %v1562_v29, %v1566_v32 }
 0x22c   :  { %v2176_v49 = vcombine.low %v2167_v34, %v2174_v38  ;;  %v2183_v52 = vrot.slane %v2175_v61, %v4364_v28  ;;  %v3026_v51 = vcombine.low %v1570_v36, %v1574_v42  ;;  %v3027_v0 = vcombine.low %v1578_v44, %v1582_v37 }
 0x22d   :  { %3395 = vperm.xlu0 %3794, %v3024_v46   ;;  %v3028_v20 = vcombine.low %v1586_v39, %v1590_v40  ;;  %v3035_v57 = vrot.slane %v3025_v48, %v4364_v28  ;;  %v1498_v58 = vrot.slane %v4498_v50, %v4338_v1  ;;  %v1502_v59 = vrot.slane %v4498_v50, %v4341_v4 }
 0x22e   :  { %v2190_v9 = vrot.slane %v2176_v49, %v4364_v28  ;;  %v3042_v45 = vrot.slane %v3026_v51, %v4364_v28  ;;  %v3049_v60 = vrot.slane %v3027_v0, %v4364_v28  ;;  %v1506_v62 = vrot.slane %v4498_v50, %v4344_v5 }
 0x22f   :  { %v3056_v23 = vrot.slane %v3028_v20, %v4364_v28  ;;  %v1510_v3 = vrot.slane %v4498_v50, %v4349_v15  ;;  %v1514_v25 = vrot.slane %v4498_v50, %v4352_v16  ;;  %v1518_v7 = vrot.slane %v4498_v50, %v4355_v17 }
 0x230   :  { %v2191_v8 = vcombine.low %v2183_v52, %v2190_v9  ;;  %v3057_v11 = vcombine.low %v3035_v57, %v3042_v45  ;;  %v1522_v12 = vrot.slane %v4498_v50, %v4358_v22  ;;  %v1526_v13 = vrot.slane %v4498_v50, %v4361_v27 }
 0x231   :  { %v3058_v14 = vcombine.low %v3049_v60, %v3056_v23  ;;  %v2927_v18 = vcombine.low %v1498_v58, %v1502_v59  ;;  %v2928_v63 = vcombine.low %v1506_v62, %v1510_v3  ;;  %v2929_v24 = vcombine.low %v1514_v25, %v1518_v7 }
 0x232   :  { %3344 = vperm.xlu1 %3795, %v2191_v8   ;;  %v3065_v29 = vrot.slane %v3057_v11, %v4364_v28  ;;  %v2930_v31 = vcombine.low %v1522_v12, %v1526_v13  ;;  %v1594_v10 = vrot.slane %v4566_v55, %v4338_v1  ;;  %v1598_v30 = vrot.slane %v4566_v55, %v4341_v4 }
 0x233   :  { %v3072_v32 = vrot.slane %v3058_v14, %v4364_v28  ;;  %v2937_v33 = vrot.slane %v2927_v18, %v4364_v28  ;;  %v2944_v50 = vrot.slane %v2928_v63, %v4364_v28  ;;  %v2951_v34 = vrot.slane %v2929_v24, %v4364_v28 }
 0x234   :  { %v2958_v36 = vrot.slane %v2930_v31, %v4364_v28  ;;  %v1602_v42 = vrot.slane %v4566_v55, %v4344_v5  ;;  %v1606_v38 = vrot.slane %v4566_v55, %v4349_v15  ;;  %v1610_v61 = vrot.slane %v4566_v55, %v4352_v16 }
 0x235   :  { %v3073_v44 = vcombine.low %v3065_v29, %v3072_v32  ;;  %v2959_v37 = vcombine.low %v2937_v33, %v2944_v50  ;;  %v1614_v46 = vrot.slane %v4566_v55, %v4355_v17  ;;  %v1618_v39 = vrot.slane %v4566_v55, %v4358_v22 }
 0x236   :  { %v2960_v40 = vcombine.low %v2951_v34, %v2958_v36  ;;  %v1622_v48 = vrot.slane %v4566_v55, %v4361_v27  ;;  %v3074_v49 = vcombine.low %v1594_v10, %v1598_v30  ;;  %v3075_v52 = vcombine.low %v1602_v42, %v1606_v38 }
 0x237   :  { %3398 = vperm.xlu0 %3794, %v3073_v44   ;;  %v2967_v51 = vrot.slane %v2959_v37, %v4364_v28  ;;  %v3076_v0 = vcombine.low %v1610_v61, %v1614_v46  ;;  %v1626_v20 = vrot.slane %v4611_v2, %v4338_v1  ;;  %v1630_v57 = vrot.slane %v4611_v2, %v4341_v4 }
 0x238   :  { %v2974_v58 = vrot.slane %v2960_v40, %v4364_v28  ;;  %v3077_v59 = vcombine.low %v1618_v39, %v1622_v48  ;;  %v3084_v9 = vrot.slane %v3074_v49, %v4364_v28  ;;  %v3091_v45 = vrot.slane %v3075_v52, %v4364_v28 }
 0x239   :  { %v3098_v55 = vrot.slane %v3076_v0, %v4364_v28  ;;  %v1634_v60 = vrot.slane %v4611_v2, %v4344_v5  ;;  %v1638_v62 = vrot.slane %v4611_v2, %v4349_v15  ;;  %v1642_v23 = vrot.slane %v4611_v2, %v4352_v16 }
 0x23a   :  { %v2975_v3 = vcombine.low %v2967_v51, %v2974_v58  ;;  %v3105_v25 = vrot.slane %v3077_v59, %v4364_v28  ;;  %v3106_v7 = vcombine.low %v3084_v9, %v3091_v45  ;;  %v1646_v8 = vrot.slane %v4611_v2, %v4355_v17 }
 0x23b   :  { %v1650_v11 = vrot.slane %v4611_v2, %v4358_v22  ;;  %v1654_v12 = vrot.slane %v4611_v2, %v4361_v27  ;;  %v3123_v13 = vcombine.low %v1626_v20, %v1630_v57  ;;  %v3124_v14 = vcombine.low %v1634_v60, %v1638_v62 }
 0x23c   :  { %3392 = vperm.xlu1 %3795, %v2975_v3   ;;  %v3107_v18 = vcombine.low %v3098_v55, %v3105_v25  ;;  %v3114_v63 = vrot.slane %v3106_v7, %v4364_v28  ;;  %v3125_v24 = vcombine.low %v1642_v23, %v1646_v8  ;;  %v1050_v29 = vrot.slane %v4562_v47, %v4338_v1 }
 0x23d   :  { %v3126_v31 = vcombine.low %v1650_v11, %v1654_v12  ;;  %v3133_v10 = vrot.slane %v3123_v13, %v4364_v28  ;;  %v3140_v30 = vrot.slane %v3124_v14, %v4364_v28  ;;  %v1054_v32 = vrot.slane %v4562_v47, %v4341_v4 }
 0x23e   :  { %v3121_v2 = vrot.slane %v3107_v18, %v4364_v28  ;;  %v3147_v33 = vrot.slane %v3125_v24, %v4364_v28  ;;  %v1058_v50 = vrot.slane %v4562_v47, %v4344_v5  ;;  %v1062_v34 = vrot.slane %v4562_v47, %v4349_v15 }
 0x23f   :  { %v3154_v36 = vrot.slane %v3126_v31, %v4364_v28  ;;  %v3155_v42 = vcombine.low %v3133_v10, %v3140_v30  ;;  %v1066_v38 = vrot.slane %v4562_v47, %v4352_v16  ;;  %v1070_v61 = vrot.slane %v4562_v47, %v4355_v17 }
 0x240   :  { %v3122_v44 = vcombine.low %v3114_v63, %v3121_v2  ;;  %v1074_v37 = vrot.slane %v4562_v47, %v4358_v22  ;;  %v1078_v46 = vrot.slane %v4562_v47, %v4361_v27  ;;  %v2241_v39 = vcombine.low %v1050_v29, %v1054_v32 }
 0x241   :  { %v3156_v40 = vcombine.low %v3147_v33, %v3154_v36  ;;  %v3163_v48 = vrot.slane %v3155_v42, %v4364_v28  ;;  %v2242_v49 = vcombine.low %v1058_v50, %v1062_v34  ;;  %v2243_v52 = vcombine.low %v1066_v38, %v1070_v61 }
 0x242   :  { %3401 = vperm.xlu0 %3794, %v3122_v44   ;;  %v2244_v51 = vcombine.low %v1074_v37, %v1078_v46  ;;  %v2251_v0 = vrot.slane %v2241_v39, %v4364_v28  ;;  %v1658_v20 = vrot.slane %v4664_v41, %v4338_v1  ;;  %v1662_v57 = vrot.slane %v4664_v41, %v4341_v4 }
 0x243   :  { %v3170_v58 = vrot.slane %v3156_v40, %v4364_v28  ;;  %v2258_v47 = vrot.slane %v2242_v49, %v4364_v28  ;;  %v2265_v59 = vrot.slane %v2243_v52, %v4364_v28  ;;  %v1666_v9 = vrot.slane %v4664_v41, %v4344_v5 }
 0x244   :  { %v2272_v45 = vrot.slane %v2244_v51, %v4364_v28  ;;  %v1670_v55 = vrot.slane %v4664_v41, %v4349_v15  ;;  %v1674_v60 = vrot.slane %v4664_v41, %v4352_v16  ;;  %v1678_v62 = vrot.slane %v4664_v41, %v4355_v17 }
 0x245   :  { %v3171_v23 = vcombine.low %v3163_v48, %v3170_v58  ;;  %v2273_v3 = vcombine.low %v2251_v0, %v2258_v47  ;;  %v1682_v25 = vrot.slane %v4664_v41, %v4358_v22  ;;  %v1686_v7 = vrot.slane %v4664_v41, %v4361_v27 }
 0x246   :  { %v2274_v8 = vcombine.low %v2265_v59, %v2272_v45  ;;  %v3172_v11 = vcombine.low %v1658_v20, %v1662_v57  ;;  %v3173_v12 = vcombine.low %v1666_v9, %v1670_v55  ;;  %v3174_v13 = vcombine.low %v1674_v60, %v1678_v62 }
 0x247   :  { %3404 = vperm.xlu0 %3794, %v3171_v23   ;;  %v2281_v14 = vrot.slane %v2273_v3, %v4364_v28  ;;  %v3175_v18 = vcombine.low %v1682_v25, %v1686_v7  ;;  %v1082_v63 = vrot.slane %v4606_v56, %v4338_v1  ;;  %v1086_v24 = vrot.slane %v4606_v56, %v4341_v4 }
 0x248   :  { %v2288_v29 = vrot.slane %v2274_v8, %v4364_v28  ;;  %v3182_v31 = vrot.slane %v3172_v11, %v4364_v28  ;;  %v3189_v41 = vrot.slane %v3173_v12, %v4364_v28  ;;  %v3196_v10 = vrot.slane %v3174_v13, %v4364_v28 }
 0x249   :  { %v3203_v30 = vrot.slane %v3175_v18, %v4364_v28  ;;  %v1090_v32 = vrot.slane %v4606_v56, %v4344_v5  ;;  %v1094_v2 = vrot.slane %v4606_v56, %v4349_v15  ;;  %v1098_v33 = vrot.slane %v4606_v56, %v4352_v16 }
 0x24a   :  { %v2289_v50 = vcombine.low %v2281_v14, %v2288_v29  ;;  %v3204_v34 = vcombine.low %v3182_v31, %v3189_v41  ;;  %v1102_v36 = vrot.slane %v4606_v56, %v4355_v17  ;;  %v1106_v42 = vrot.slane %v4606_v56, %v4358_v22 }
 0x24b   :  { %v3205_v38 = vcombine.low %v3196_v10, %v3203_v30  ;;  %v1110_v61 = vrot.slane %v4606_v56, %v4361_v27  ;;  %v2290_v44 = vcombine.low %v1082_v63, %v1086_v24  ;;  %v2291_v37 = vcombine.low %v1090_v32, %v1094_v2 }
 0x24c   :  { %3350 = vperm.xlu1 %3795, %v2289_v50   ;;  %v3212_v46 = vrot.slane %v3204_v34, %v4364_v28  ;;  %v2292_v39 = vcombine.low %v1098_v33, %v1102_v36  ;;  %v1690_v40 = vrot.slane %v4688_v53, %v4338_v1  ;;  %v1694_v48 = vrot.slane %v4688_v53, %v4341_v4 }
 0x24d   :  { %v3219_v49 = vrot.slane %v3205_v38, %v4364_v28  ;;  %v2293_v52 = vcombine.low %v1106_v42, %v1110_v61  ;;  %v2300_v51 = vrot.slane %v2290_v44, %v4364_v28  ;;  %v2307_v0 = vrot.slane %v2291_v37, %v4364_v28 }
 0x24e   :  { %v2314_v56 = vrot.slane %v2292_v39, %v4364_v28  ;;  %v1698_v20 = vrot.slane %v4688_v53, %v4344_v5  ;;  %v1702_v57 = vrot.slane %v4688_v53, %v4349_v15  ;;  %v1706_v58 = vrot.slane %v4688_v53, %v4352_v16 }
 0x24f   :  { %v3220_v47 = vcombine.low %v3212_v46, %v3219_v49  ;;  %v2321_v59 = vrot.slane %v2293_v52, %v4364_v28  ;;  %v2322_v9 = vcombine.low %v2300_v51, %v2307_v0  ;;  %v1710_v45 = vrot.slane %v4688_v53, %v4355_v17 }
 0x250   :  { %v1714_v55 = vrot.slane %v4688_v53, %v4358_v22  ;;  %v1718_v60 = vrot.slane %v4688_v53, %v4361_v27  ;;  %v3221_v62 = vcombine.low %v1690_v40, %v1694_v48  ;;  %v3222_v23 = vcombine.low %v1698_v20, %v1702_v57 }
 0x251   :  { %3407 = vperm.xlu0 %3794, %v3220_v47   ;;  %v2323_v3 = vcombine.low %v2314_v56, %v2321_v59  ;;  %v2330_v25 = vrot.slane %v2322_v9, %v4364_v28  ;;  %v3223_v7 = vcombine.low %v1706_v58, %v1710_v45  ;;  %v1114_v8 = vrot.slane %v4658_v35, %v4338_v1 }
 0x252   :  { %v3224_v11 = vcombine.low %v1714_v55, %v1718_v60  ;;  %v3231_v12 = vrot.slane %v3221_v62, %v4364_v28  ;;  %v3238_v13 = vrot.slane %v3222_v23, %v4364_v28  ;;  %v1118_v14 = vrot.slane %v4658_v35, %v4341_v4 }
 0x253   :  { %v2337_v53 = vrot.slane %v2323_v3, %v4364_v28  ;;  %v3245_v18 = vrot.slane %v3223_v7, %v4364_v28  ;;  %v1122_v63 = vrot.slane %v4658_v35, %v4344_v5  ;;  %v1126_v24 = vrot.slane %v4658_v35, %v4349_v15 }
 0x254   :  { %v3252_v29 = vrot.slane %v3224_v11, %v4364_v28  ;;  %v3253_v31 = vcombine.low %v3231_v12, %v3238_v13  ;;  %v1130_v41 = vrot.slane %v4658_v35, %v4352_v16  ;;  %v1134_v10 = vrot.slane %v4658_v35, %v4355_v17 }
 0x255   :  { %v2338_v30 = vcombine.low %v2330_v25, %v2337_v53  ;;  %v1138_v32 = vrot.slane %v4658_v35, %v4358_v22  ;;  %v1142_v2 = vrot.slane %v4658_v35, %v4361_v27  ;;  %v2339_v33 = vcombine.low %v1114_v8, %v1118_v14 }
 0x256   :  { %v3254_v50 = vcombine.low %v3245_v18, %v3252_v29  ;;  %v3261_v34 = vrot.slane %v3253_v31, %v4364_v28  ;;  %v2340_v36 = vcombine.low %v1122_v63, %v1126_v24  ;;  %v2341_v42 = vcombine.low %v1130_v41, %v1134_v10 }
 0x257   :  { %3353 = vperm.xlu1 %3795, %v2338_v30   ;;  %v2342_v38 = vcombine.low %v1138_v32, %v1142_v2  ;;  %v2349_v61 = vrot.slane %v2339_v33, %v4364_v28  ;;  %v1722_v44 = vrot.slane %v4729_v21, %v4338_v1  ;;  %v1726_v37 = vrot.slane %v4729_v21, %v4341_v4 }
 0x258   :  { %v3268_v46 = vrot.slane %v3254_v50, %v4364_v28  ;;  %v2356_v35 = vrot.slane %v2340_v36, %v4364_v28  ;;  %v2363_v39 = vrot.slane %v2341_v42, %v4364_v28  ;;  %v1730_v40 = vrot.slane %v4729_v21, %v4344_v5 }
 0x259   :  { %v2370_v48 = vrot.slane %v2342_v38, %v4364_v28  ;;  %v1734_v49 = vrot.slane %v4729_v21, %v4349_v15  ;;  %v1738_v52 = vrot.slane %v4729_v21, %v4352_v16  ;;  %v1742_v51 = vrot.slane %v4729_v21, %v4355_v17 }
 0x25a   :  { %v3269_v0 = vcombine.low %v3261_v34, %v3268_v46  ;;  %v2371_v56 = vcombine.low %v2349_v61, %v2356_v35  ;;  %v1746_v20 = vrot.slane %v4729_v21, %v4358_v22  ;;  %v1750_v57 = vrot.slane %v4729_v21, %v4361_v27 }
 0x25b   :  { %v2372_v58 = vcombine.low %v2363_v39, %v2370_v48  ;;  %v3270_v47 = vcombine.low %v1722_v44, %v1726_v37  ;;  %v3271_v59 = vcombine.low %v1730_v40, %v1734_v49  ;;  %v3272_v9 = vcombine.low %v1738_v52, %v1742_v51 }
 0x25c   :  { %3410 = vperm.xlu0 %3794, %v3269_v0   ;;  %v2379_v45 = vrot.slane %v2371_v56, %v4364_v28  ;;  %v3273_v55 = vcombine.low %v1746_v20, %v1750_v57  ;;  %v1146_v60 = vrot.slane %v4682_v26, %v4338_v1  ;;  %v1150_v62 = vrot.slane %v4682_v26, %v4341_v4 }
 0x25d   :  { %v2386_v23 = vrot.slane %v2372_v58, %v4364_v28  ;;  %v3280_v3 = vrot.slane %v3270_v47, %v4364_v28  ;;  %v3287_v21 = vrot.slane %v3271_v59, %v4364_v28  ;;  %v3294_v25 = vrot.slane %v3272_v9, %v4364_v28 }
 0x25e   :  { %v3301_v7 = vrot.slane %v3273_v55, %v4364_v28  ;;  %v1154_v8 = vrot.slane %v4682_v26, %v4344_v5  ;;  %v1158_v11 = vrot.slane %v4682_v26, %v4349_v15  ;;  %v1162_v12 = vrot.slane %v4682_v26, %v4352_v16 }
 0x25f   :  { %v2387_v13 = vcombine.low %v2379_v45, %v2386_v23  ;;  %v3302_v14 = vcombine.low %v3280_v3, %v3287_v21  ;;  %v1166_v53 = vrot.slane %v4682_v26, %v4355_v17  ;;  %v1170_v18 = vrot.slane %v4682_v26, %v4358_v22 }
 0x260   :  { %v3303_v63 = vcombine.low %v3294_v25, %v3301_v7  ;;  %v1174_v24 = vrot.slane %v4682_v26, %v4361_v27  ;;  %v2388_v29 = vcombine.low %v1146_v60, %v1150_v62  ;;  %v2389_v31 = vcombine.low %v1154_v8, %v1158_v11 }
 0x261   :  { %3356 = vperm.xlu1 %3795, %v2387_v13   ;;  %v3310_v41 = vrot.slane %v3302_v14, %v4364_v28  ;;  %v2390_v10 = vcombine.low %v1162_v12, %v1166_v53  ;;  %v1178_v30 = vrot.slane %v4724_v6, %v4338_v1  ;;  %v1182_v32 = vrot.slane %v4724_v6, %v4341_v4 }
 0x262   :  { %v3317_v2 = vrot.slane %v3303_v63, %v4364_v28  ;;  %v2391_v33 = vcombine.low %v1170_v18, %v1174_v24  ;;  %v2398_v50 = vrot.slane %v2388_v29, %v4364_v28  ;;  %v2405_v34 = vrot.slane %v2389_v31, %v4364_v28  ;;  %v3369_v18 = vpop.permute.xlu1 %3368 }
 0x263   :  { %v2412_v26 = vrot.slane %v2390_v10, %v4364_v28  ;;  %v1186_v36 = vrot.slane %v4724_v6, %v4344_v5  ;;  %v1190_v42 = vrot.slane %v4724_v6, %v4349_v15  ;;  %v1194_v38 = vrot.slane %v4724_v6, %v4352_v16  ;;  %v3321_v10 = vpop.permute.xlu0 %3320 }
 0x264   :  { %v3318_v61 = vcombine.low %v3310_v41, %v3317_v2  ;;  %v2419_v44 = vrot.slane %v2391_v33, %v4364_v28  ;;  %v2420_v37 = vcombine.low %v2398_v50, %v2405_v34  ;;  %v1198_v46 = vrot.slane %v4724_v6, %v4355_v17 }
 0x265   :  { %v1202_v35 = vrot.slane %v4724_v6, %v4358_v22  ;;  %v1206_v39 = vrot.slane %v4724_v6, %v4361_v27  ;;  %v2437_v40 = vcombine.low %v1178_v30, %v1182_v32  ;;  %v2438_v48 = vcombine.low %v1186_v36, %v1190_v42 }
 0x266   :  { %3413 = vperm.xlu0 %3794, %v3318_v61   ;;  %v2421_v49 = vcombine.low %v2412_v26, %v2419_v44  ;;  %v2428_v52 = vrot.slane %v2420_v37, %v4364_v28  ;;  %v2439_v51 = vcombine.low %v1194_v38, %v1198_v46  ;;  %v1210_v0 = vrot.slane %v4777_v19, %v4338_v1  ;;  %v5143_v63 = vpop.permute.xlu1 %3323 }
 0x267   :  { %v2440_v56 = vcombine.low %v1202_v35, %v1206_v39  ;;  %v2447_v20 = vrot.slane %v2437_v40, %v4364_v28  ;;  %v2454_v57 = vrot.slane %v2438_v48, %v4364_v28  ;;  %v1214_v58 = vrot.slane %v4777_v19, %v4341_v4  ;;  %v3372_v32 = vpop.permute.xlu0 %3371 }
 0x268   :  { %v2435_v6 = vrot.slane %v2421_v49, %v4364_v28  ;;  %v2461_v47 = vrot.slane %v2439_v51, %v4364_v28  ;;  %v1218_v59 = vrot.slane %v4777_v19, %v4344_v5  ;;  %v1222_v9 = vrot.slane %v4777_v19, %v4349_v15 }
 0x269   :  { %v2468_v1 = vrot.slane %v2440_v56, %v4364_v28  ;;  %v2469_v45 = vcombine.low %v2447_v20, %v2454_v57  ;;  %v1226_v55 = vrot.slane %v4777_v19, %v4352_v16  ;;  %v1230_v60 = vrot.slane %v4777_v19, %v4355_v17 }
 0x26a   :  { %v2436_v4 = vcombine.low %v2428_v52, %v2435_v6  ;;  %v1234_v62 = vrot.slane %v4777_v19, %v4358_v22  ;;  %v1238_v23 = vrot.slane %v4777_v19, %v4361_v27  ;;  %v2486_v5 = vcombine.low %v1210_v0, %v1214_v58  ;;  %v5145_v24 = vpop.permute.xlu1 %3326 }
 0x26b   :  { %v2470_v3 = vcombine.low %v2461_v47, %v2468_v1  ;;  %v2477_v15 = vrot.slane %v2469_v45, %v4364_v28  ;;  %v2487_v21 = vcombine.low %v1218_v59, %v1222_v9  ;;  %v2488_v25 = vcombine.low %v1226_v55, %v1230_v60  ;;  %v3378_v33 = vpop.permute.xlu0 %3377 }
 0x26c   :  { %3359 = vperm.xlu1 %3795, %v2436_v4   ;;  %v2489_v7 = vcombine.low %v1234_v62, %v1238_v23  ;;  %v2496_v16 = vrot.slane %v2486_v5, %v4364_v28  ;;  %v5166_v37 = vand.u32 127, %v727_v43 }
 0x26d   :  { %v2484_v8 = vrot.slane %v2470_v3, %v4364_v28  ;;  %v2503_v17 = vrot.slane %v2487_v21, %v4364_v28  ;;  %v2510_v11 = vrot.slane %v2488_v25, %v4364_v28 }
 0x26e   :  { %v2517_v22 = vrot.slane %v2489_v7, %v4364_v28  ;;  %v3375_v29 = vpop.permute.xlu1 %3374  ;;  %v3421_v46 = vadd.s32 4294967288, %v5166_v37  ;;  %v3428_v35 = vadd.s32 4294967280, %v5166_v37  ;;  %v3435_v48 = vadd.s32 4294967272, %v5166_v37 }
 0x26f   :  { %v2485_v12 = vcombine.low %v2477_v15, %v2484_v8  ;;  %v2518_v27 = vcombine.low %v2496_v16, %v2503_v17  ;;  %v3419_v49 = vsub.s32 %v5166_v37, %v4333_v54  ;;  %v3442_v0 = vadd.s32 4294967264, %v5166_v37 }
 0x270   :  { %v2519_v19 = vcombine.low %v2510_v11, %v2517_v22  ;;  %v3424_v52 = vsub.s32 %v3421_v46, %v4333_v54  ;;  %v3431_v51 = vsub.s32 %v3428_v35, %v4333_v54  ;;  %v3438_v20 = vsub.s32 %v3435_v48, %v4333_v54 }
 0x271   :  { %3362 = vperm.xlu1 %3795, %v2485_v12   ;;  %v2526_v13 = vrot.slane %v2518_v27, %v4364_v28  ;;  %v3449_v57 = vadd.s32 4294967256, %v5166_v37  ;;  %v3529_v59 = vrot.slane %v3369_v18, %v3419_v49  ;;  %v3445_v9 = vsub.s32 %v3442_v0, %v4333_v54 }
 0x272   :  { %v2533_v14 = vrot.slane %v2519_v19, %v4364_v28  ;;  %v5147_v31 = vpop.permute.xlu1 %3329  ;;  %v3533_v56 = vrot.slane %v3372_v32, %v3424_v52  ;;  %v3538_v58 = vrot.slane %v3375_v29, %v3431_v51  ;;  %v3456_v1 = vadd.s32 4294967248, %v5166_v37 }
 0x273   :  { %v3543_v55 = vrot.slane %v3378_v33, %v3438_v20  ;;  %v3452_v60 = vsub.s32 %v3449_v57, %v4333_v54  ;;  %v3463_v23 = vadd.s32 4294967240, %v5166_v37  ;;  %v3470_v3 = vadd.s32 4294967232, %v5166_v37 }
 0x274   :  { %v2534_v53 = vcombine.low %v2526_v13, %v2533_v14  ;;  %v3534_v45 = vsel %vm3426_vm0, %v3533_v56, %v3529_v59  ;;  %v3459_v5 = vsub.s32 %v3456_v1, %v4333_v54  ;;  %v3425_v25 = vrot.slane %v5143_v63, %v3424_v52 }
 0x275   :  { %v3539_v4 = vsel %vm3433_vm1, %v3538_v58, %v3534_v45  ;;  %v3420_v11 = vrot.slane %v3321_v10, %v3419_v49  ;;  %v3432_v22 = vrot.slane %v5145_v24, %v3431_v51  ;;  %v3466_v12 = vsub.s32 %v3463_v23, %v4333_v54 }
 0x276   :  { %3365 = vperm.xlu1 %3795, %v2534_v53   ;;  %v3544_v7 = vsel %vm3440_vm2, %v3543_v55, %v3539_v4  ;;  %v3439_v27 = vrot.slane %v5147_v31, %v3438_v20  ;;  %v3473_v19 = vsub.s32 %v3470_v3, %v4333_v54  ;;  %v3477_v53 = vadd.s32 4294967224, %v5166_v37 }
 0x277   :  { %v5149_v41 = vpop.permute.xlu1 %3332  ;;  %v3427_v13 = vsel %vm3426_vm0, %v3425_v25, %v3420_v11  ;;  %v3484_v63 = vadd.s32 4294967216, %v5166_v37  ;;  %v3491_v35 = vadd.s32 4294967208, %v5166_v37 }
 0x278   :  { %v3434_v31 = vsel %vm3433_vm1, %v3432_v22, %v3427_v13  ;;  %v3446_v33 = vrot.slane %v5149_v41, %v3445_v9 }
 0x279   :  { %v3441_v32 = vsel %vm3440_vm2, %v3439_v27, %v3434_v31  ;;  %v3487_v48 = vsub.s32 %v3484_v63, %v4333_v54 }
 0x27a   :  { %v3448_v51 = vsel %vm3447_vm3, %v3446_v33, %v3441_v32 }
 0x27f   :  { %v3384_v34 = vpop.permute.xlu0 %3383 }
 0x280   :  { %v3553_v16 = vrot.slane %v3384_v34, %v3452_v60 }
 0x285   :  { %v3381_v30 = vpop.permute.xlu1 %3380 }
 0x286   :  { %v3548_v62 = vrot.slane %v3381_v30, %v3445_v9 }
 0x288   :  { %v3549_v8 = vsel %vm3447_vm3, %v3548_v62, %v3544_v7 }
 0x289   :  { %v3554_v14 = vsel %vm3454_vm4, %v3553_v16, %v3549_v8 }
 0x28c   :  { %v5151_v2 = vpop.permute.xlu1 %3335 }
 0x28d   :  { %v3453_v34 = vrot.slane %v5151_v2, %v3452_v60  ;;  %v3505_v2 = vadd.s32 4294967192, %v5166_v37 }
 0x28f   :  { %v3455_v57 = vsel %vm3454_vm4, %v3453_v34, %v3448_v51  ;;  %v3508_v45 = vsub.s32 %v3505_v2, %v4333_v54 }
 0x291   :  { %v5155_v26 = vpop.permute.xlu0 %3389 }
 0x292   :  { %v3563_v30 = vrot.slane %v5155_v26, %v3466_v12  ;;  %v3498_v26 = vadd.s32 4294967200, %v5166_v37 }
 0x294   :  { %v3501_v1 = vsub.s32 %v3498_v26, %v4333_v54 }
 0x296   :  { %v5153_v50 = vpop.permute.xlu1 %3338 }
 0x29c   :  { %v3387_v36 = vpop.permute.xlu1 %3386 }
 0x29d   :  { %v3558_v17 = vrot.slane %v3387_v36, %v3459_v5  ;;  %v3480_v36 = vsub.s32 %v3477_v53, %v4333_v54 }
 0x29f   :  { %v3559_v18 = vsel %vm3461_vm5, %v3558_v17, %v3554_v14 }
 0x2a0   :  { %v3564_v46 = vsel %vm3468_vm6, %v3563_v30, %v3559_v18 }
 0x2a1   :  { %v5157_v42 = vpop.permute.xlu0 %3347 }
 0x2a6   :  { %v5159_v38 = vpop.permute.xlu1 %3341 }
 0x2a7   :  { %v3467_v52 = vrot.slane %v5159_v38, %v3466_v12  ;;  %v3494_v38 = vsub.s32 %v3491_v35, %v4333_v54 }
 0x2ac   :  { %v5161_v61 = vpop.permute.xlu0 %3395 }
 0x2ad   :  { %v3573_v41 = vrot.slane %v5161_v61, %v3480_v36  ;;  %v3519_v61 = vadd.s32 4294967176, %v5166_v37 }
 0x2b1   :  { %v5163_v44 = vpop.permute.xlu1 %3344 }
 0x2b2   :  { %v3474_v0 = vrot.slane %v5163_v44, %v3473_v19 }
 0x2b6   :  { %v5170_v39 = vpop.permute.xlu0 %3398 }
 0x2b7   :  { %v3578_v9 = vrot.slane %v5170_v39, %v3487_v48 }
 0x2bb   :  { %v5172_v40 = vpop.permute.xlu1 %3392 }
 0x2bc   :  { %v3568_v24 = vrot.slane %v5172_v40, %v3473_v19  ;;  %v3460_v40 = vrot.slane %v5153_v50, %v3459_v5  ;;  %v3512_v50 = vadd.s32 4294967184, %v5166_v37  ;;  %v3481_v37 = vrot.slane %v5157_v42, %v3480_v36 }
 0x2bd   :  { %v3522_v5 = vsub.s32 %v3519_v61, %v4333_v54 }
 0x2be   :  { %v3569_v49 = vsel %vm3475_vm7, %v3568_v24, %v3564_v46  ;;  %v3462_v59 = vsel %vm3461_vm5, %v3460_v40, %v3455_v57  ;;  %v3515_v62 = vsub.s32 %v3512_v50, %v4333_v54 }
 0x2bf   :  { %v3574_v58 = vsel %vm3482_vm8, %v3573_v41, %v3569_v49  ;;  %v3469_v44 = vsel %vm3468_vm6, %v3467_v52, %v3462_v59 }
 0x2c0   :  { %v3476_v55 = vsel %vm3475_vm7, %v3474_v0, %v3469_v44  ;;  %v3579_v60 = vsel %vm3489_vm9, %v3578_v9, %v3574_v58 }
 0x2c1   :  { %v5182_v6 = vpop.permute.xlu0 %3401 }
 0x2c2   :  { %v3583_v23 = vrot.slane %v5182_v6, %v3494_v38 }
 0x2c4   :  { %v3584_v8 = vsel %vm3496_vm10, %v3583_v23, %v3579_v60 }
 0x2c6   :  { %v5194_v15 = vpop.permute.xlu0 %3404 }
 0x2c7   :  { %v3588_v25 = vrot.slane %v5194_v15, %v3501_v1 }
 0x2c9   :  { %v3589_v15 = vsel %vm3503_vm11, %v3588_v25, %v3584_v8 }
 0x2cb   :  { %v5184_v47 = vpop.permute.xlu1 %3350 }
 0x2cc   :  { %v3488_v4 = vrot.slane %v5184_v47, %v3487_v48  ;;  %v3483_v47 = vsel %vm3482_vm8, %v3481_v37, %v3476_v55 }
 0x2ce   :  { %v3490_v42 = vsel %vm3489_vm9, %v3488_v4, %v3483_v47 }
 0x2d0   :  { %v5211_v29 = vpop.permute.xlu0 %3407 }
 0x2d1   :  { %v3593_v17 = vrot.slane %v5211_v29, %v3508_v45 }
 0x2d3   :  { %v3594_v19 = vsel %vm3510_vm12, %v3593_v17, %v3589_v15 }
 0x2d6   :  { %v5196_v21 = vpop.permute.xlu1 %3353 }
 0x2d7   :  { %v3495_v39 = vrot.slane %v5196_v21, %v3494_v38 }
 0x2d9   :  { %v3497_v54 = vsel %vm3496_vm10, %v3495_v39, %v3490_v42 }
 0x2db   :  { %v3411_v56 = vpop.permute.xlu0 %3410 }
 0x2dc   :  { %v3598_v6 = vrot.slane %v3411_v56, %v3515_v62 }
 0x2de   :  { %v3599_v53 = vsel %vm3517_vm13, %v3598_v6, %v3594_v19 }
 0x2e0   :  { %v3357_v10 = vpop.permute.xlu1 %3356 }
 0x2e1   :  { %v3502_v7 = vrot.slane %v3357_v10, %v3501_v1 }
 0x2e3   :  { %v3504_v12 = vsel %vm3503_vm11, %v3502_v7, %v3497_v54 }
 0x2e5   :  { %v3414_v16 = vpop.permute.xlu0 %3413 }
 0x2e6   :  { %v3603_v22 = vrot.slane %v3414_v16, %v3522_v5 }
 0x2e8   :  { %v3604_v63 = vsel %vm3524_vm14, %v3603_v22, %v3599_v53 }
 0x2eb   :  { %v3360_v20 = vpop.permute.xlu1 %3359 }
 0x2ec   :  { %v3509_v11 = vrot.slane %v3360_v20, %v3508_v45 }
 0x2ee   :  { %v3511_v13 = vsel %vm3510_vm12, %v3509_v11, %v3504_v12 }
 0x2f0   :  { %v3363_v3 = vpop.permute.xlu1 %3362 }
 0x2f1   :  { %v3516_v21 = vrot.slane %v3363_v3, %v3515_v62 }
 0x2f3   :  { %v3518_v18 = vsel %vm3517_vm13, %v3516_v21, %v3511_v13 }
 0x2f5   :  { %v3366_v27 = vpop.permute.xlu1 %3365 }
 0x2f6   :  { %v3523_v14 = vrot.slane %v3366_v27, %v3522_v5 }
 0x2f8   :  { %v3525_v24 = vsel %vm3524_vm14, %v3523_v14, %v3518_v18 }
 0x2f9   :  { %v3605_v29 = vcombine.low %v3525_v24, %v3604_v63 }
 0x2fb   :  { %v3612_v10 = vrot.slane %v3605_v29, %v4364_v28 }
 0x2fd   :  { %v3619_v31 = vrot.slane %v3612_v10, %v4364_v28 }
 0x2ff   :  { %3625 = vst.msk [vmem:[%s5267_s5] sm:$0x3] %vm3623_vm15, %v3619_v31 }

</bundles_post_ra>
